<compile_context>
chip_gen: v5e
topology: v5e:2x2
jax: 0.10.0
libtpu: 0.0.40
codegen_flags: <defaults>
</compile_context>

<pallas_src>
import functools

import jax
import jax.numpy as jnp
from jax import lax
from jax.experimental import pallas as pl
from jax.experimental.pallas import tpu as pltpu


def mha_kernel(x_ref, wqkv_ref, bqkv_ref, wout_ref, bout_ref, o_ref,
               qkv_ref, ctx_ref, *, num_heads, head_dim, block_b, seq_len):
    E = num_heads * head_dim
    N = seq_len
    rows = block_b * N

    # (block_b, N, E) -> (rows, E): merges non-lane dims only (N % 8 == 0 or
    # block_b == 1 is guaranteed by the wrapper).
    x = x_ref[...].reshape(rows, E).astype(jnp.bfloat16)

    # QKV projection for all rows in the block at once.  Weights are already
    # bf16 and the q columns are pre-scaled by 1/sqrt(Dh) in the wrapper.
    qkv = jnp.dot(x, wqkv_ref[...],
                  preferred_element_type=jnp.float32) + bqkv_ref[...]
    qkv_ref[...] = qkv.astype(jnp.bfloat16)            # (rows, 3E) bf16 scratch

    # Attention per batch row / head; head outputs land in a lane-dense
    # (rows, E) bf16 scratch slab (ctx_ref) at their lane offset.
    for b in range(block_b):
        r0 = b * N
        for h in range(num_heads):
            lo = h * head_dim
            q = qkv_ref[r0:r0 + N, lo:lo + head_dim]                   # (N, Dh)
            k = qkv_ref[r0:r0 + N, E + lo:E + lo + head_dim]           # (N, Dh)
            v = qkv_ref[r0:r0 + N, 2 * E + lo:2 * E + lo + head_dim]   # (N, Dh)

            # q @ k^T without materializing a transposed copy of k; scale is
            # already folded into q via the pre-scaled W_qkv columns.
            scores = lax.dot_general(
                q, k, dimension_numbers=(((1,), (1,)), ((), ())),
                preferred_element_type=jnp.float32)                    # (N, N)

            # Numerically-stable softmax in f32.
            m = jnp.max(scores, axis=-1, keepdims=True)
            p = jnp.exp(scores - m)
            denom = jnp.sum(p, axis=-1, keepdims=True)
            probs = (p * pl.reciprocal(denom, approx=True)).astype(jnp.bfloat16)

            ctx_ref[r0:r0 + N, lo:lo + head_dim] = jnp.dot(
                probs, v, preferred_element_type=jnp.float32
            ).astype(jnp.bfloat16)

    # One full-K output projection for the whole block: (rows, E) @ (E, E).
    out = jnp.dot(ctx_ref[...], wout_ref[...],
                  preferred_element_type=jnp.float32) + bout_ref[...]
    o_ref[...] = out.reshape(block_b, N, E).astype(o_ref.dtype)


def multi_head_attention(x, w_qkv, b_qkv, w_out, b_out, *,
                         num_heads, block_b=None):
    B, N, E = x.shape
    head_dim = E // num_heads
    assert head_dim * num_heads == E

    if block_b is None:
        if N % 8 != 0:
            # Merging rows across a non-8-aligned sublane boundary would
            # materialize VMEM copies of the activation slab every step.
            block_b = 1
        else:
            target_rows = 256   # fills v6e/v7x 256-deep MXU; 2 passes on v5e
            block_b = max(1, min(B, pl.cdiv(target_rows, N)))
            while B % block_b != 0:
                block_b -= 1
    assert B % block_b == 0
    grid = (B // block_b,)
    rows = block_b * N

    # --- Wrapper-side weight prep (runs once, outside the kernel) ----------
    scale = jnp.float32(head_dim) ** -0.5
    # Fold 1/sqrt(Dh) into the q columns of the QKV projection.
    w_qkv = w_qkv.at[:, :E].multiply(scale)
    b_qkv = b_qkv.at[:, :E].multiply(scale)
    # bf16 MXU operands; biases stay f32 (added to f32 accumulators).
    w_qkv_bf = w_qkv.astype(jnp.bfloat16)
    w_out_bf = w_out.astype(jnp.bfloat16)
    b_qkv_f32 = b_qkv.astype(jnp.float32)
    b_out_f32 = b_out.astype(jnp.float32)

    kernel = functools.partial(mha_kernel, num_heads=num_heads,
                               head_dim=head_dim, block_b=block_b, seq_len=N)

    # VMEM budget estimate (worst case: double-buffered everything) + margin.
    est = (2 * 2 * rows * E * x.dtype.itemsize            # x in + out blocks
           + 2 * (E * 3 * E + E * E) * 2                  # bf16 weights
           + 2 * (3 * E + E) * 4                          # f32 biases
           + rows * (3 * E + E) * 2)                      # bf16 scratch slabs
    vmem_limit = int(min(100 * 1024 * 1024, max(2 * est, 16 * 1024 * 1024)))

    out_shape = jax.ShapeDtypeStruct((B, N, E), x.dtype)
    scratch_shapes = [
        pltpu.VMEM((rows, 3 * E), jnp.bfloat16),   # qkv slab
        pltpu.VMEM((rows, E), jnp.bfloat16),       # per-head context slab
    ]

    def run(buffered):
        # Resident operands: index_map is constant, so they are fetched once;
        # Buffered(1) additionally drops their double-buffer VMEM copy.
        wkw = dict(pipeline_mode=pl.Buffered(1)) if buffered else {}
        in_specs = [
            pl.BlockSpec((block_b, N, E), lambda i: (i, 0, 0)),          # x
            pl.BlockSpec((E, 3 * E), lambda i: (0, 0), **wkw),           # W_qkv
            pl.BlockSpec((1, 3 * E), lambda i: (0, 0), **wkw),           # b_qkv
            pl.BlockSpec((E, E), lambda i: (0, 0), **wkw),               # W_out
            pl.BlockSpec((1, E), lambda i: (0, 0), **wkw),               # b_out
        ]
        return pl.pallas_call(
            kernel,
            out_shape=out_shape,
            grid_spec=pltpu.PrefetchScalarGridSpec(
                num_scalar_prefetch=0,
                grid=grid,
                in_specs=in_specs,
                out_specs=pl.BlockSpec((block_b, N, E), lambda i: (i, 0, 0)),
                scratch_shapes=scratch_shapes),
            compiler_params=pltpu.CompilerParams(
                dimension_semantics=("parallel",),
                vmem_limit_bytes=vmem_limit),
        )(x, w_qkv_bf, b_qkv_f32, w_out_bf, b_out_f32)

    try:
        return run(buffered=True)
    except Exception:
        # Fallback if this Pallas version rejects single-buffered BlockSpecs.
        return run(buffered=False)


def reference_mha(x, w_qkv, b_qkv, w_out, b_out, *, num_heads):
    B, N, E = x.shape
    head_dim = E // num_heads
    qkv = jnp.einsum("bne,ef->bnf", x, w_qkv) + b_qkv[0]
    qkv = qkv.reshape(B, N, 3, num_heads, head_dim).transpose(2, 0, 3, 1, 4)
    q, k, v = qkv[0], qkv[1], qkv[2]
    attn = jnp.einsum("bhqd,bhkd->bhqk", q, k) * (head_dim ** -0.5)
    attn = jax.nn.softmax(attn, axis=-1)
    out = jnp.einsum("bhqk,bhkd->bhqd", attn, v)
    out = out.transpose(0, 2, 1, 3).reshape(B, N, E)
    return jnp.einsum("bne,ef->bnf", out, w_out) + b_out[0]


if __name__ == "__main__":
    B, N, E, H = 2, 8, 32, 4

    key = jax.random.PRNGKey(0)
    k_x, k_wqkv, k_bqkv, k_wout, k_bout = jax.random.split(key, 5)

    x = jax.random.normal(k_x, (B, N, E), dtype=jnp.float32)
    # Deterministic synthetic parameters (shapes match the nn.Linear layers,
    # stored as (in, out) == torch weight.T).
    w_qkv = jax.random.normal(k_wqkv, (E, 3 * E), dtype=jnp.float32) * 0.02
    b_qkv = jax.random.normal(k_bqkv, (1, 3 * E), dtype=jnp.float32) * 0.02
    w_out = jax.random.normal(k_wout, (E, E), dtype=jnp.float32) * 0.02
    b_out = jax.random.normal(k_bout, (1, E), dtype=jnp.float32) * 0.02

    out = multi_head_attention(x, w_qkv, b_qkv, w_out, b_out, num_heads=H)
    out = jax.block_until_ready(out)

    ref = reference_mha(x, w_qkv, b_qkv, w_out, b_out, num_heads=H)
    assert out.shape == (B, N, E)
    # bf16 MXU operands + approx reciprocal -> slightly looser agreement with
    # the pure-f32 reference.
    assert jnp.allclose(out, ref, atol=1e-2, rtol=1e-2), (
        float(jnp.max(jnp.abs(out - ref))))

    print("KERNEL_OK")
</pallas_src>

<mosaic_0001>
module attributes {stable_mosaic.version = 11 : i64} {
  func.func @mha_kernel(%arg0: i32, %arg1: memref<2x8x32xf32, #tpu.memory_space<vmem>>, %arg2: memref<32x96xbf16, #tpu.memory_space<vmem>>, %arg3: memref<1x96xf32, #tpu.memory_space<vmem>>, %arg4: memref<32x32xbf16, #tpu.memory_space<vmem>>, %arg5: memref<1x32xf32, #tpu.memory_space<vmem>>, %arg6: memref<2x8x32xf32, #tpu.memory_space<vmem>>, %arg7: memref<16x96xbf16, #tpu.memory_space<vmem>>, %arg8: memref<16x32xbf16, #tpu.memory_space<vmem>>) attributes {dimension_semantics = [#tpu.dimension_semantics<parallel>], iteration_bounds = array<i64: 1>, scalar_prefetch = 0 : i64, scratch_operands = 2 : i64, tpu.core_type = #tpu.core_type<tc>, window_params = [{transform_indices = @transform_0, window_bounds = array<i64: 2, 8, 32>}, {pipeline_mode = #tpu.pipeline_mode<synchronous>, transform_indices = @transform_1, window_bounds = array<i64: 32, 96>}, {pipeline_mode = #tpu.pipeline_mode<synchronous>, transform_indices = @transform_2, window_bounds = array<i64: 1, 96>}, {pipeline_mode = #tpu.pipeline_mode<synchronous>, transform_indices = @transform_3, window_bounds = array<i64: 32, 32>}, {pipeline_mode = #tpu.pipeline_mode<synchronous>, transform_indices = @transform_4, window_bounds = array<i64: 1, 32>}, {transform_indices = @transform_5, window_bounds = array<i64: 2, 8, 32>}]} {
    %c0 = arith.constant 0 : index
    %c0_0 = arith.constant 0 : index
    %c0_1 = arith.constant 0 : index
    %0 = vector.load %arg1[%c0, %c0_0, %c0_1] : memref<2x8x32xf32, #tpu.memory_space<vmem>>, vector<2x8x32xf32>
    %1 = vector.shape_cast %0 : vector<2x8x32xf32> to vector<16x32xf32>
    %2 = arith.truncf %1 : vector<16x32xf32> to vector<16x32xbf16>
    %c0_2 = arith.constant 0 : index
    %c0_3 = arith.constant 0 : index
    %3 = vector.load %arg2[%c0_2, %c0_3] : memref<32x96xbf16, #tpu.memory_space<vmem>>, vector<32x96xbf16>
    %cst = arith.constant dense<0.000000e+00> : vector<16x96xf32>
    %4 = tpu.matmul %2, %3, %cst {dimension_numbers = #tpu.dot_dimension_numbers<[1], [0], [0], [1], [0, 0, 1, 1], [], []>} : vector<16x32xbf16>, vector<32x96xbf16>, vector<16x96xf32> -> vector<16x96xf32>
    %c0_4 = arith.constant 0 : index
    %c0_5 = arith.constant 0 : index
    %5 = vector.load %arg3[%c0_4, %c0_5] : memref<1x96xf32, #tpu.memory_space<vmem>>, vector<1x96xf32>
    %6 = vector.broadcast %5 : vector<1x96xf32> to vector<16x96xf32>
    %7 = arith.addf %4, %6 : vector<16x96xf32>
    %8 = arith.truncf %7 : vector<16x96xf32> to vector<16x96xbf16>
    %c0_6 = arith.constant 0 : index
    %c0_7 = arith.constant 0 : index
    %9 = vector.load %arg7[%c0_6, %c0_7] : memref<16x96xbf16, #tpu.memory_space<vmem>>, vector<16x96xbf16>
    tpu.vector_store %arg7[%c0_6, %c0_7], %8 {strides = array<i32>} : memref<16x96xbf16, #tpu.memory_space<vmem>>, vector<16x96xbf16>,
    %c0_8 = arith.constant 0 : index
    %c0_9 = arith.constant 0 : index
    %10 = vector.load %arg7[%c0_8, %c0_9] : memref<16x96xbf16, #tpu.memory_space<vmem>>, vector<8x8xbf16>
    %c0_10 = arith.constant 0 : index
    %c32 = arith.constant 32 : index
    %11 = vector.load %arg7[%c0_10, %c32] : memref<16x96xbf16, #tpu.memory_space<vmem>>, vector<8x8xbf16>
    %c0_11 = arith.constant 0 : index
    %c64 = arith.constant 64 : index
    %12 = vector.load %arg7[%c0_11, %c64] : memref<16x96xbf16, #tpu.memory_space<vmem>>, vector<8x8xbf16>
    %cst_12 = arith.constant dense<0.000000e+00> : vector<8x8xf32>
    %13 = tpu.matmul %10, %11, %cst_12 {dimension_numbers = #tpu.dot_dimension_numbers<[1], [1], [0], [0], [0, 0, 1, 0], [], []>} : vector<8x8xbf16>, vector<8x8xbf16>, vector<8x8xf32> -> vector<8x8xf32>
    %cst_13 = arith.constant dense<0xFF800000> : vector<8xf32>
    %14 = vector.multi_reduction <maximumf>, %13, %cst_13 [1] : vector<8x8xf32> to vector<8xf32>
    %15 = vector.shape_cast %14 : vector<8xf32> to vector<8x1xf32>
    %16 = vector.broadcast %15 : vector<8x1xf32> to vector<8x8xf32>
    %17 = arith.subf %13, %16 : vector<8x8xf32>
    %18 = math.exp %17 : vector<8x8xf32>
    %cst_14 = arith.constant dense<0.000000e+00> : vector<8xf32>
    %19 = vector.multi_reduction <add>, %18, %cst_14 [1] : vector<8x8xf32> to vector<8xf32>
    %20 = vector.shape_cast %19 : vector<8xf32> to vector<8x1xf32>
    %21 = tpu.reciprocal %20 {approx = true} : vector<8x1xf32> -> vector<8x1xf32>
    %22 = vector.broadcast %21 : vector<8x1xf32> to vector<8x8xf32>
    %23 = arith.mulf %18, %22 : vector<8x8xf32>
    %24 = arith.truncf %23 : vector<8x8xf32> to vector<8x8xbf16>
    %cst_15 = arith.constant dense<0.000000e+00> : vector<8x8xf32>
    %25 = tpu.matmul %24, %12, %cst_15 {dimension_numbers = #tpu.dot_dimension_numbers<[1], [0], [0], [1], [0, 0, 1, 1], [], []>} : vector<8x8xbf16>, vector<8x8xbf16>, vector<8x8xf32> -> vector<8x8xf32>
    %26 = arith.truncf %25 : vector<8x8xf32> to vector<8x8xbf16>
    %c0_16 = arith.constant 0 : index
    %c0_17 = arith.constant 0 : index
    %27 = vector.load %arg8[%c0_16, %c0_17] : memref<16x32xbf16, #tpu.memory_space<vmem>>, vector<8x8xbf16>
    tpu.vector_store %arg8[%c0_16, %c0_17], %26 {strides = array<i32>} : memref<16x32xbf16, #tpu.memory_space<vmem>>, vector<8x8xbf16>,
    %c0_18 = arith.constant 0 : index
    %c8 = arith.constant 8 : index
    %28 = vector.load %arg7[%c0_18, %c8] : memref<16x96xbf16, #tpu.memory_space<vmem>>, vector<8x8xbf16>
    %c0_19 = arith.constant 0 : index
    %c40 = arith.constant 40 : index
    %29 = vector.load %arg7[%c0_19, %c40] : memref<16x96xbf16, #tpu.memory_space<vmem>>, vector<8x8xbf16>
    %c0_20 = arith.constant 0 : index
    %c72 = arith.constant 72 : index
    %30 = vector.load %arg7[%c0_20, %c72] : memref<16x96xbf16, #tpu.memory_space<vmem>>, vector<8x8xbf16>
    %cst_21 = arith.constant dense<0.000000e+00> : vector<8x8xf32>
    %31 = tpu.matmul %28, %29, %cst_21 {dimension_numbers = #tpu.dot_dimension_numbers<[1], [1], [0], [0], [0, 0, 1, 0], [], []>} : vector<8x8xbf16>, vector<8x8xbf16>, vector<8x8xf32> -> vector<8x8xf32>
    %cst_22 = arith.constant dense<0xFF800000> : vector<8xf32>
    %32 = vector.multi_reduction <maximumf>, %31, %cst_22 [1] : vector<8x8xf32> to vector<8xf32>
    %33 = vector.shape_cast %32 : vector<8xf32> to vector<8x1xf32>
    %34 = vector.broadcast %33 : vector<8x1xf32> to vector<8x8xf32>
    %35 = arith.subf %31, %34 : vector<8x8xf32>
    %36 = math.exp %35 : vector<8x8xf32>
    %cst_23 = arith.constant dense<0.000000e+00> : vector<8xf32>
    %37 = vector.multi_reduction <add>, %36, %cst_23 [1] : vector<8x8xf32> to vector<8xf32>
    %38 = vector.shape_cast %37 : vector<8xf32> to vector<8x1xf32>
    %39 = tpu.reciprocal %38 {approx = true} : vector<8x1xf32> -> vector<8x1xf32>
    %40 = vector.broadcast %39 : vector<8x1xf32> to vector<8x8xf32>
    %41 = arith.mulf %36, %40 : vector<8x8xf32>
    %42 = arith.truncf %41 : vector<8x8xf32> to vector<8x8xbf16>
    %cst_24 = arith.constant dense<0.000000e+00> : vector<8x8xf32>
    %43 = tpu.matmul %42, %30, %cst_24 {dimension_numbers = #tpu.dot_dimension_numbers<[1], [0], [0], [1], [0, 0, 1, 1], [], []>} : vector<8x8xbf16>, vector<8x8xbf16>, vector<8x8xf32> -> vector<8x8xf32>
    %44 = arith.truncf %43 : vector<8x8xf32> to vector<8x8xbf16>
    %c0_25 = arith.constant 0 : index
    %c8_26 = arith.constant 8 : index
    %45 = vector.load %arg8[%c0_25, %c8_26] : memref<16x32xbf16, #tpu.memory_space<vmem>>, vector<8x8xbf16>
    tpu.vector_store %arg8[%c0_25, %c8_26], %44 {strides = array<i32>} : memref<16x32xbf16, #tpu.memory_space<vmem>>, vector<8x8xbf16>,
    %c0_27 = arith.constant 0 : index
    %c16 = arith.constant 16 : index
    %46 = vector.load %arg7[%c0_27, %c16] : memref<16x96xbf16, #tpu.memory_space<vmem>>, vector<8x8xbf16>
    %c0_28 = arith.constant 0 : index
    %c48 = arith.constant 48 : index
    %47 = vector.load %arg7[%c0_28, %c48] : memref<16x96xbf16, #tpu.memory_space<vmem>>, vector<8x8xbf16>
    %c0_29 = arith.constant 0 : index
    %c80 = arith.constant 80 : index
    %48 = vector.load %arg7[%c0_29, %c80] : memref<16x96xbf16, #tpu.memory_space<vmem>>, vector<8x8xbf16>
    %cst_30 = arith.constant dense<0.000000e+00> : vector<8x8xf32>
    %49 = tpu.matmul %46, %47, %cst_30 {dimension_numbers = #tpu.dot_dimension_numbers<[1], [1], [0], [0], [0, 0, 1, 0], [], []>} : vector<8x8xbf16>, vector<8x8xbf16>, vector<8x8xf32> -> vector<8x8xf32>
    %cst_31 = arith.constant dense<0xFF800000> : vector<8xf32>
    %50 = vector.multi_reduction <maximumf>, %49, %cst_31 [1] : vector<8x8xf32> to vector<8xf32>
    %51 = vector.shape_cast %50 : vector<8xf32> to vector<8x1xf32>
    %52 = vector.broadcast %51 : vector<8x1xf32> to vector<8x8xf32>
    %53 = arith.subf %49, %52 : vector<8x8xf32>
    %54 = math.exp %53 : vector<8x8xf32>
    %cst_32 = arith.constant dense<0.000000e+00> : vector<8xf32>
    %55 = vector.multi_reduction <add>, %54, %cst_32 [1] : vector<8x8xf32> to vector<8xf32>
    %56 = vector.shape_cast %55 : vector<8xf32> to vector<8x1xf32>
    %57 = tpu.reciprocal %56 {approx = true} : vector<8x1xf32> -> vector<8x1xf32>
    %58 = vector.broadcast %57 : vector<8x1xf32> to vector<8x8xf32>
    %59 = arith.mulf %54, %58 : vector<8x8xf32>
    %60 = arith.truncf %59 : vector<8x8xf32> to vector<8x8xbf16>
    %cst_33 = arith.constant dense<0.000000e+00> : vector<8x8xf32>
    %61 = tpu.matmul %60, %48, %cst_33 {dimension_numbers = #tpu.dot_dimension_numbers<[1], [0], [0], [1], [0, 0, 1, 1], [], []>} : vector<8x8xbf16>, vector<8x8xbf16>, vector<8x8xf32> -> vector<8x8xf32>
    %62 = arith.truncf %61 : vector<8x8xf32> to vector<8x8xbf16>
    %c0_34 = arith.constant 0 : index
    %c16_35 = arith.constant 16 : index
    %63 = vector.load %arg8[%c0_34, %c16_35] : memref<16x32xbf16, #tpu.memory_space<vmem>>, vector<8x8xbf16>
    tpu.vector_store %arg8[%c0_34, %c16_35], %62 {strides = array<i32>} : memref<16x32xbf16, #tpu.memory_space<vmem>>, vector<8x8xbf16>,
    %c0_36 = arith.constant 0 : index
    %c24 = arith.constant 24 : index
    %64 = vector.load %arg7[%c0_36, %c24] : memref<16x96xbf16, #tpu.memory_space<vmem>>, vector<8x8xbf16>
    %c0_37 = arith.constant 0 : index
    %c56 = arith.constant 56 : index
    %65 = vector.load %arg7[%c0_37, %c56] : memref<16x96xbf16, #tpu.memory_space<vmem>>, vector<8x8xbf16>
    %c0_38 = arith.constant 0 : index
    %c88 = arith.constant 88 : index
    %66 = vector.load %arg7[%c0_38, %c88] : memref<16x96xbf16, #tpu.memory_space<vmem>>, vector<8x8xbf16>
    %cst_39 = arith.constant dense<0.000000e+00> : vector<8x8xf32>
    %67 = tpu.matmul %64, %65, %cst_39 {dimension_numbers = #tpu.dot_dimension_numbers<[1], [1], [0], [0], [0, 0, 1, 0], [], []>} : vector<8x8xbf16>, vector<8x8xbf16>, vector<8x8xf32> -> vector<8x8xf32>
    %cst_40 = arith.constant dense<0xFF800000> : vector<8xf32>
    %68 = vector.multi_reduction <maximumf>, %67, %cst_40 [1] : vector<8x8xf32> to vector<8xf32>
    %69 = vector.shape_cast %68 : vector<8xf32> to vector<8x1xf32>
    %70 = vector.broadcast %69 : vector<8x1xf32> to vector<8x8xf32>
    %71 = arith.subf %67, %70 : vector<8x8xf32>
    %72 = math.exp %71 : vector<8x8xf32>
    %cst_41 = arith.constant dense<0.000000e+00> : vector<8xf32>
    %73 = vector.multi_reduction <add>, %72, %cst_41 [1] : vector<8x8xf32> to vector<8xf32>
    %74 = vector.shape_cast %73 : vector<8xf32> to vector<8x1xf32>
    %75 = tpu.reciprocal %74 {approx = true} : vector<8x1xf32> -> vector<8x1xf32>
    %76 = vector.broadcast %75 : vector<8x1xf32> to vector<8x8xf32>
    %77 = arith.mulf %72, %76 : vector<8x8xf32>
    %78 = arith.truncf %77 : vector<8x8xf32> to vector<8x8xbf16>
    %cst_42 = arith.constant dense<0.000000e+00> : vector<8x8xf32>
    %79 = tpu.matmul %78, %66, %cst_42 {dimension_numbers = #tpu.dot_dimension_numbers<[1], [0], [0], [1], [0, 0, 1, 1], [], []>} : vector<8x8xbf16>, vector<8x8xbf16>, vector<8x8xf32> -> vector<8x8xf32>
    %80 = arith.truncf %79 : vector<8x8xf32> to vector<8x8xbf16>
    %c0_43 = arith.constant 0 : index
    %c24_44 = arith.constant 24 : index
    %81 = vector.load %arg8[%c0_43, %c24_44] : memref<16x32xbf16, #tpu.memory_space<vmem>>, vector<8x8xbf16>
    tpu.vector_store %arg8[%c0_43, %c24_44], %80 {strides = array<i32>} : memref<16x32xbf16, #tpu.memory_space<vmem>>, vector<8x8xbf16>,
    %c8_45 = arith.constant 8 : index
    %c0_46 = arith.constant 0 : index
    %82 = vector.load %arg7[%c8_45, %c0_46] : memref<16x96xbf16, #tpu.memory_space<vmem>>, vector<8x8xbf16>
    %c8_47 = arith.constant 8 : index
    %c32_48 = arith.constant 32 : index
    %83 = vector.load %arg7[%c8_47, %c32_48] : memref<16x96xbf16, #tpu.memory_space<vmem>>, vector<8x8xbf16>
    %c8_49 = arith.constant 8 : index
    %c64_50 = arith.constant 64 : index
    %84 = vector.load %arg7[%c8_49, %c64_50] : memref<16x96xbf16, #tpu.memory_space<vmem>>, vector<8x8xbf16>
    %cst_51 = arith.constant dense<0.000000e+00> : vector<8x8xf32>
    %85 = tpu.matmul %82, %83, %cst_51 {dimension_numbers = #tpu.dot_dimension_numbers<[1], [1], [0], [0], [0, 0, 1, 0], [], []>} : vector<8x8xbf16>, vector<8x8xbf16>, vector<8x8xf32> -> vector<8x8xf32>
    %cst_52 = arith.constant dense<0xFF800000> : vector<8xf32>
    %86 = vector.multi_reduction <maximumf>, %85, %cst_52 [1] : vector<8x8xf32> to vector<8xf32>
    %87 = vector.shape_cast %86 : vector<8xf32> to vector<8x1xf32>
    %88 = vector.broadcast %87 : vector<8x1xf32> to vector<8x8xf32>
    %89 = arith.subf %85, %88 : vector<8x8xf32>
    %90 = math.exp %89 : vector<8x8xf32>
    %cst_53 = arith.constant dense<0.000000e+00> : vector<8xf32>
    %91 = vector.multi_reduction <add>, %90, %cst_53 [1] : vector<8x8xf32> to vector<8xf32>
    %92 = vector.shape_cast %91 : vector<8xf32> to vector<8x1xf32>
    %93 = tpu.reciprocal %92 {approx = true} : vector<8x1xf32> -> vector<8x1xf32>
    %94 = vector.broadcast %93 : vector<8x1xf32> to vector<8x8xf32>
    %95 = arith.mulf %90, %94 : vector<8x8xf32>
    %96 = arith.truncf %95 : vector<8x8xf32> to vector<8x8xbf16>
    %cst_54 = arith.constant dense<0.000000e+00> : vector<8x8xf32>
    %97 = tpu.matmul %96, %84, %cst_54 {dimension_numbers = #tpu.dot_dimension_numbers<[1], [0], [0], [1], [0, 0, 1, 1], [], []>} : vector<8x8xbf16>, vector<8x8xbf16>, vector<8x8xf32> -> vector<8x8xf32>
    %98 = arith.truncf %97 : vector<8x8xf32> to vector<8x8xbf16>
    %c8_55 = arith.constant 8 : index
    %c0_56 = arith.constant 0 : index
    %99 = vector.load %arg8[%c8_55, %c0_56] : memref<16x32xbf16, #tpu.memory_space<vmem>>, vector<8x8xbf16>
    tpu.vector_store %arg8[%c8_55, %c0_56], %98 {strides = array<i32>} : memref<16x32xbf16, #tpu.memory_space<vmem>>, vector<8x8xbf16>,
    %c8_57 = arith.constant 8 : index
    %c8_58 = arith.constant 8 : index
    %100 = vector.load %arg7[%c8_57, %c8_58] : memref<16x96xbf16, #tpu.memory_space<vmem>>, vector<8x8xbf16>
    %c8_59 = arith.constant 8 : index
    %c40_60 = arith.constant 40 : index
    %101 = vector.load %arg7[%c8_59, %c40_60] : memref<16x96xbf16, #tpu.memory_space<vmem>>, vector<8x8xbf16>
    %c8_61 = arith.constant 8 : index
    %c72_62 = arith.constant 72 : index
    %102 = vector.load %arg7[%c8_61, %c72_62] : memref<16x96xbf16, #tpu.memory_space<vmem>>, vector<8x8xbf16>
    %cst_63 = arith.constant dense<0.000000e+00> : vector<8x8xf32>
    %103 = tpu.matmul %100, %101, %cst_63 {dimension_numbers = #tpu.dot_dimension_numbers<[1], [1], [0], [0], [0, 0, 1, 0], [], []>} : vector<8x8xbf16>, vector<8x8xbf16>, vector<8x8xf32> -> vector<8x8xf32>
    %cst_64 = arith.constant dense<0xFF800000> : vector<8xf32>
    %104 = vector.multi_reduction <maximumf>, %103, %cst_64 [1] : vector<8x8xf32> to vector<8xf32>
    %105 = vector.shape_cast %104 : vector<8xf32> to vector<8x1xf32>
    %106 = vector.broadcast %105 : vector<8x1xf32> to vector<8x8xf32>
    %107 = arith.subf %103, %106 : vector<8x8xf32>
    %108 = math.exp %107 : vector<8x8xf32>
    %cst_65 = arith.constant dense<0.000000e+00> : vector<8xf32>
    %109 = vector.multi_reduction <add>, %108, %cst_65 [1] : vector<8x8xf32> to vector<8xf32>
    %110 = vector.shape_cast %109 : vector<8xf32> to vector<8x1xf32>
    %111 = tpu.reciprocal %110 {approx = true} : vector<8x1xf32> -> vector<8x1xf32>
    %112 = vector.broadcast %111 : vector<8x1xf32> to vector<8x8xf32>
    %113 = arith.mulf %108, %112 : vector<8x8xf32>
    %114 = arith.truncf %113 : vector<8x8xf32> to vector<8x8xbf16>
    %cst_66 = arith.constant dense<0.000000e+00> : vector<8x8xf32>
    %115 = tpu.matmul %114, %102, %cst_66 {dimension_numbers = #tpu.dot_dimension_numbers<[1], [0], [0], [1], [0, 0, 1, 1], [], []>} : vector<8x8xbf16>, vector<8x8xbf16>, vector<8x8xf32> -> vector<8x8xf32>
    %116 = arith.truncf %115 : vector<8x8xf32> to vector<8x8xbf16>
    %c8_67 = arith.constant 8 : index
    %c8_68 = arith.constant 8 : index
    %117 = vector.load %arg8[%c8_67, %c8_68] : memref<16x32xbf16, #tpu.memory_space<vmem>>, vector<8x8xbf16>
    tpu.vector_store %arg8[%c8_67, %c8_68], %116 {strides = array<i32>} : memref<16x32xbf16, #tpu.memory_space<vmem>>, vector<8x8xbf16>,
    %c8_69 = arith.constant 8 : index
    %c16_70 = arith.constant 16 : index
    %118 = vector.load %arg7[%c8_69, %c16_70] : memref<16x96xbf16, #tpu.memory_space<vmem>>, vector<8x8xbf16>
    %c8_71 = arith.constant 8 : index
    %c48_72 = arith.constant 48 : index
    %119 = vector.load %arg7[%c8_71, %c48_72] : memref<16x96xbf16, #tpu.memory_space<vmem>>, vector<8x8xbf16>
    %c8_73 = arith.constant 8 : index
    %c80_74 = arith.constant 80 : index
    %120 = vector.load %arg7[%c8_73, %c80_74] : memref<16x96xbf16, #tpu.memory_space<vmem>>, vector<8x8xbf16>
    %cst_75 = arith.constant dense<0.000000e+00> : vector<8x8xf32>
    %121 = tpu.matmul %118, %119, %cst_75 {dimension_numbers = #tpu.dot_dimension_numbers<[1], [1], [0], [0], [0, 0, 1, 0], [], []>} : vector<8x8xbf16>, vector<8x8xbf16>, vector<8x8xf32> -> vector<8x8xf32>
    %cst_76 = arith.constant dense<0xFF800000> : vector<8xf32>
    %122 = vector.multi_reduction <maximumf>, %121, %cst_76 [1] : vector<8x8xf32> to vector<8xf32>
    %123 = vector.shape_cast %122 : vector<8xf32> to vector<8x1xf32>
    %124 = vector.broadcast %123 : vector<8x1xf32> to vector<8x8xf32>
    %125 = arith.subf %121, %124 : vector<8x8xf32>
    %126 = math.exp %125 : vector<8x8xf32>
    %cst_77 = arith.constant dense<0.000000e+00> : vector<8xf32>
    %127 = vector.multi_reduction <add>, %126, %cst_77 [1] : vector<8x8xf32> to vector<8xf32>
    %128 = vector.shape_cast %127 : vector<8xf32> to vector<8x1xf32>
    %129 = tpu.reciprocal %128 {approx = true} : vector<8x1xf32> -> vector<8x1xf32>
    %130 = vector.broadcast %129 : vector<8x1xf32> to vector<8x8xf32>
    %131 = arith.mulf %126, %130 : vector<8x8xf32>
    %132 = arith.truncf %131 : vector<8x8xf32> to vector<8x8xbf16>
    %cst_78 = arith.constant dense<0.000000e+00> : vector<8x8xf32>
    %133 = tpu.matmul %132, %120, %cst_78 {dimension_numbers = #tpu.dot_dimension_numbers<[1], [0], [0], [1], [0, 0, 1, 1], [], []>} : vector<8x8xbf16>, vector<8x8xbf16>, vector<8x8xf32> -> vector<8x8xf32>
    %134 = arith.truncf %133 : vector<8x8xf32> to vector<8x8xbf16>
    %c8_79 = arith.constant 8 : index
    %c16_80 = arith.constant 16 : index
    %135 = vector.load %arg8[%c8_79, %c16_80] : memref<16x32xbf16, #tpu.memory_space<vmem>>, vector<8x8xbf16>
    tpu.vector_store %arg8[%c8_79, %c16_80], %134 {strides = array<i32>} : memref<16x32xbf16, #tpu.memory_space<vmem>>, vector<8x8xbf16>,
    %c8_81 = arith.constant 8 : index
    %c24_82 = arith.constant 24 : index
    %136 = vector.load %arg7[%c8_81, %c24_82] : memref<16x96xbf16, #tpu.memory_space<vmem>>, vector<8x8xbf16>
    %c8_83 = arith.constant 8 : index
    %c56_84 = arith.constant 56 : index
    %137 = vector.load %arg7[%c8_83, %c56_84] : memref<16x96xbf16, #tpu.memory_space<vmem>>, vector<8x8xbf16>
    %c8_85 = arith.constant 8 : index
    %c88_86 = arith.constant 88 : index
    %138 = vector.load %arg7[%c8_85, %c88_86] : memref<16x96xbf16, #tpu.memory_space<vmem>>, vector<8x8xbf16>
    %cst_87 = arith.constant dense<0.000000e+00> : vector<8x8xf32>
    %139 = tpu.matmul %136, %137, %cst_87 {dimension_numbers = #tpu.dot_dimension_numbers<[1], [1], [0], [0], [0, 0, 1, 0], [], []>} : vector<8x8xbf16>, vector<8x8xbf16>, vector<8x8xf32> -> vector<8x8xf32>
    %cst_88 = arith.constant dense<0xFF800000> : vector<8xf32>
    %140 = vector.multi_reduction <maximumf>, %139, %cst_88 [1] : vector<8x8xf32> to vector<8xf32>
    %141 = vector.shape_cast %140 : vector<8xf32> to vector<8x1xf32>
    %142 = vector.broadcast %141 : vector<8x1xf32> to vector<8x8xf32>
    %143 = arith.subf %139, %142 : vector<8x8xf32>
    %144 = math.exp %143 : vector<8x8xf32>
    %cst_89 = arith.constant dense<0.000000e+00> : vector<8xf32>
    %145 = vector.multi_reduction <add>, %144, %cst_89 [1] : vector<8x8xf32> to vector<8xf32>
    %146 = vector.shape_cast %145 : vector<8xf32> to vector<8x1xf32>
    %147 = tpu.reciprocal %146 {approx = true} : vector<8x1xf32> -> vector<8x1xf32>
    %148 = vector.broadcast %147 : vector<8x1xf32> to vector<8x8xf32>
    %149 = arith.mulf %144, %148 : vector<8x8xf32>
    %150 = arith.truncf %149 : vector<8x8xf32> to vector<8x8xbf16>
    %cst_90 = arith.constant dense<0.000000e+00> : vector<8x8xf32>
    %151 = tpu.matmul %150, %138, %cst_90 {dimension_numbers = #tpu.dot_dimension_numbers<[1], [0], [0], [1], [0, 0, 1, 1], [], []>} : vector<8x8xbf16>, vector<8x8xbf16>, vector<8x8xf32> -> vector<8x8xf32>
    %152 = arith.truncf %151 : vector<8x8xf32> to vector<8x8xbf16>
    %c8_91 = arith.constant 8 : index
    %c24_92 = arith.constant 24 : index
    %153 = vector.load %arg8[%c8_91, %c24_92] : memref<16x32xbf16, #tpu.memory_space<vmem>>, vector<8x8xbf16>
    tpu.vector_store %arg8[%c8_91, %c24_92], %152 {strides = array<i32>} : memref<16x32xbf16, #tpu.memory_space<vmem>>, vector<8x8xbf16>,
    %c0_93 = arith.constant 0 : index
    %c0_94 = arith.constant 0 : index
    %154 = vector.load %arg8[%c0_93, %c0_94] : memref<16x32xbf16, #tpu.memory_space<vmem>>, vector<16x32xbf16>
    %c0_95 = arith.constant 0 : index
    %c0_96 = arith.constant 0 : index
    %155 = vector.load %arg4[%c0_95, %c0_96] : memref<32x32xbf16, #tpu.memory_space<vmem>>, vector<32x32xbf16>
    %cst_97 = arith.constant dense<0.000000e+00> : vector<16x32xf32>
    %156 = tpu.matmul %154, %155, %cst_97 {dimension_numbers = #tpu.dot_dimension_numbers<[1], [0], [0], [1], [0, 0, 1, 1], [], []>} : vector<16x32xbf16>, vector<32x32xbf16>, vector<16x32xf32> -> vector<16x32xf32>
    %c0_98 = arith.constant 0 : index
    %c0_99 = arith.constant 0 : index
    %157 = vector.load %arg5[%c0_98, %c0_99] : memref<1x32xf32, #tpu.memory_space<vmem>>, vector<1x32xf32>
    %158 = vector.broadcast %157 : vector<1x32xf32> to vector<16x32xf32>
    %159 = arith.addf %156, %158 : vector<16x32xf32>
    %160 = vector.shape_cast %159 : vector<16x32xf32> to vector<2x8x32xf32>
    %c0_100 = arith.constant 0 : index
    %c0_101 = arith.constant 0 : index
    %c0_102 = arith.constant 0 : index
    %161 = vector.load %arg6[%c0_100, %c0_101, %c0_102] : memref<2x8x32xf32, #tpu.memory_space<vmem>>, vector<2x8x32xf32>
    tpu.vector_store %arg6[%c0_100, %c0_101, %c0_102], %160 {strides = array<i32>} : memref<2x8x32xf32, #tpu.memory_space<vmem>>, vector<2x8x32xf32>,
    return
  }
  func.func @transform_0(%arg0: i32) -> (i32, i32, i32) {
    %c0_i32 = arith.constant 0 : i32
    %c0_i32_0 = arith.constant 0 : i32
    %c0_i32_1 = arith.constant 0 : i32
    return %arg0, %c0_i32, %c0_i32_0 : i32, i32, i32
  }
  func.func @transform_1(%arg0: i32) -> (i32, i32) {
    %c0_i32 = arith.constant 0 : i32
    %c0_i32_0 = arith.constant 0 : i32
    %c0_i32_1 = arith.constant 0 : i32
    return %c0_i32, %c0_i32_0 : i32, i32
  }
  func.func @transform_2(%arg0: i32) -> (i32, i32) {
    %c0_i32 = arith.constant 0 : i32
    %c0_i32_0 = arith.constant 0 : i32
    %c0_i32_1 = arith.constant 0 : i32
    return %c0_i32, %c0_i32_0 : i32, i32
  }
  func.func @transform_3(%arg0: i32) -> (i32, i32) {
    %c0_i32 = arith.constant 0 : i32
    %c0_i32_0 = arith.constant 0 : i32
    %c0_i32_1 = arith.constant 0 : i32
    return %c0_i32, %c0_i32_0 : i32, i32
  }
  func.func @transform_4(%arg0: i32) -> (i32, i32) {
    %c0_i32 = arith.constant 0 : i32
    %c0_i32_0 = arith.constant 0 : i32
    %c0_i32_1 = arith.constant 0 : i32
    return %c0_i32, %c0_i32_0 : i32, i32
  }
  func.func @transform_5(%arg0: i32) -> (i32, i32, i32) {
    %c0_i32 = arith.constant 0 : i32
    %c0_i32_0 = arith.constant 0 : i32
    %c0_i32_1 = arith.constant 0 : i32
    return %arg0, %c0_i32, %c0_i32_0 : i32, i32, i32
  }
}

module attributes {stable_mosaic.version = 11 : i64} {
  func.func @mha_kernel(%arg0: i32, %arg1: memref<2x8x32xf32, #tpu.memory_space<vmem>>, %arg2: memref<32x96xbf16, #tpu.memory_space<vmem>>, %arg3: memref<1x96xf32, #tpu.memory_space<vmem>>, %arg4: memref<32x32xbf16, #tpu.memory_space<vmem>>, %arg5: memref<1x32xf32, #tpu.memory_space<vmem>>, %arg6: memref<2x8x32xf32, #tpu.memory_space<vmem>>, %arg7: memref<16x96xbf16, #tpu.memory_space<vmem>>, %arg8: memref<16x32xbf16, #tpu.memory_space<vmem>>) attributes {dimension_semantics = [#tpu.dimension_semantics<parallel>], iteration_bounds = array<i64: 1>, scalar_prefetch = 0 : i64, scratch_operands = 2 : i64, tpu.core_type = #tpu.core_type<tc>, window_params = [{transform_indices = @transform_0, window_bounds = array<i64: 2, 8, 32>}, {pipeline_mode = #tpu.pipeline_mode<synchronous>, transform_indices = @transform_1, window_bounds = array<i64: 32, 96>}, {pipeline_mode = #tpu.pipeline_mode<synchronous>, transform_indices = @transform_2, window_bounds = array<i64: 1, 96>}, {pipeline_mode = #tpu.pipeline_mode<synchronous>, transform_indices = @transform_3, window_bounds = array<i64: 32, 32>}, {pipeline_mode = #tpu.pipeline_mode<synchronous>, transform_indices = @transform_4, window_bounds = array<i64: 1, 32>}, {transform_indices = @transform_5, window_bounds = array<i64: 2, 8, 32>}]} {
    %c0 = arith.constant 0 : index
    %c0_0 = arith.constant 0 : index
    %c0_1 = arith.constant 0 : index
    %0 = vector.load %arg1[%c0, %c0_0, %c0_1] : memref<2x8x32xf32, #tpu.memory_space<vmem>>, vector<2x8x32xf32>
    %1 = vector.shape_cast %0 : vector<2x8x32xf32> to vector<16x32xf32>
    %2 = arith.truncf %1 : vector<16x32xf32> to vector<16x32xbf16>
    %c0_2 = arith.constant 0 : index
    %c0_3 = arith.constant 0 : index
    %3 = vector.load %arg2[%c0_2, %c0_3] : memref<32x96xbf16, #tpu.memory_space<vmem>>, vector<32x96xbf16>
    %cst = arith.constant dense<0.000000e+00> : vector<16x96xf32>
    %4 = tpu.matmul %2, %3, %cst {dimension_numbers = #tpu.dot_dimension_numbers<[1], [0], [0], [1], [0, 0, 1, 1], [], []>} : vector<16x32xbf16>, vector<32x96xbf16>, vector<16x96xf32> -> vector<16x96xf32>
    %c0_4 = arith.constant 0 : index
    %c0_5 = arith.constant 0 : index
    %5 = vector.load %arg3[%c0_4, %c0_5] : memref<1x96xf32, #tpu.memory_space<vmem>>, vector<1x96xf32>
    %6 = vector.broadcast %5 : vector<1x96xf32> to vector<16x96xf32>
    %7 = arith.addf %4, %6 : vector<16x96xf32>
    %8 = arith.truncf %7 : vector<16x96xf32> to vector<16x96xbf16>
    %c0_6 = arith.constant 0 : index
    %c0_7 = arith.constant 0 : index
    %9 = vector.load %arg7[%c0_6, %c0_7] : memref<16x96xbf16, #tpu.memory_space<vmem>>, vector<16x96xbf16>
    tpu.vector_store %arg7[%c0_6, %c0_7], %8 {strides = array<i32>} : memref<16x96xbf16, #tpu.memory_space<vmem>>, vector<16x96xbf16>,
    %c0_8 = arith.constant 0 : index
    %c0_9 = arith.constant 0 : index
    %10 = vector.load %arg7[%c0_8, %c0_9] : memref<16x96xbf16, #tpu.memory_space<vmem>>, vector<8x8xbf16>
    %c0_10 = arith.constant 0 : index
    %c32 = arith.constant 32 : index
    %11 = vector.load %arg7[%c0_10, %c32] : memref<16x96xbf16, #tpu.memory_space<vmem>>, vector<8x8xbf16>
    %c0_11 = arith.constant 0 : index
    %c64 = arith.constant 64 : index
    %12 = vector.load %arg7[%c0_11, %c64] : memref<16x96xbf16, #tpu.memory_space<vmem>>, vector<8x8xbf16>
    %cst_12 = arith.constant dense<0.000000e+00> : vector<8x8xf32>
    %13 = tpu.matmul %10, %11, %cst_12 {dimension_numbers = #tpu.dot_dimension_numbers<[1], [1], [0], [0], [0, 0, 1, 0], [], []>} : vector<8x8xbf16>, vector<8x8xbf16>, vector<8x8xf32> -> vector<8x8xf32>
    %cst_13 = arith.constant dense<0xFF800000> : vector<8xf32>
    %14 = vector.multi_reduction <maximumf>, %13, %cst_13 [1] : vector<8x8xf32> to vector<8xf32>
    %15 = vector.shape_cast %14 : vector<8xf32> to vector<8x1xf32>
    %16 = vector.broadcast %15 : vector<8x1xf32> to vector<8x8xf32>
    %17 = arith.subf %13, %16 : vector<8x8xf32>
    %18 = math.exp %17 : vector<8x8xf32>
    %cst_14 = arith.constant dense<0.000000e+00> : vector<8xf32>
    %19 = vector.multi_reduction <add>, %18, %cst_14 [1] : vector<8x8xf32> to vector<8xf32>
    %20 = vector.shape_cast %19 : vector<8xf32> to vector<8x1xf32>
    %21 = tpu.reciprocal %20 {approx = true} : vector<8x1xf32> -> vector<8x1xf32>
    %22 = vector.broadcast %21 : vector<8x1xf32> to vector<8x8xf32>
    %23 = arith.mulf %18, %22 : vector<8x8xf32>
    %24 = arith.truncf %23 : vector<8x8xf32> to vector<8x8xbf16>
    %cst_15 = arith.constant dense<0.000000e+00> : vector<8x8xf32>
    %25 = tpu.matmul %24, %12, %cst_15 {dimension_numbers = #tpu.dot_dimension_numbers<[1], [0], [0], [1], [0, 0, 1, 1], [], []>} : vector<8x8xbf16>, vector<8x8xbf16>, vector<8x8xf32> -> vector<8x8xf32>
    %26 = arith.truncf %25 : vector<8x8xf32> to vector<8x8xbf16>
    %c0_16 = arith.constant 0 : index
    %c0_17 = arith.constant 0 : index
    %27 = vector.load %arg8[%c0_16, %c0_17] : memref<16x32xbf16, #tpu.memory_space<vmem>>, vector<8x8xbf16>
    tpu.vector_store %arg8[%c0_16, %c0_17], %26 {strides = array<i32>} : memref<16x32xbf16, #tpu.memory_space<vmem>>, vector<8x8xbf16>,
    %c0_18 = arith.constant 0 : index
    %c8 = arith.constant 8 : index
    %28 = vector.load %arg7[%c0_18, %c8] : memref<16x96xbf16, #tpu.memory_space<vmem>>, vector<8x8xbf16>
    %c0_19 = arith.constant 0 : index
    %c40 = arith.constant 40 : index
    %29 = vector.load %arg7[%c0_19, %c40] : memref<16x96xbf16, #tpu.memory_space<vmem>>, vector<8x8xbf16>
    %c0_20 = arith.constant 0 : index
    %c72 = arith.constant 72 : index
    %30 = vector.load %arg7[%c0_20, %c72] : memref<16x96xbf16, #tpu.memory_space<vmem>>, vector<8x8xbf16>
    %cst_21 = arith.constant dense<0.000000e+00> : vector<8x8xf32>
    %31 = tpu.matmul %28, %29, %cst_21 {dimension_numbers = #tpu.dot_dimension_numbers<[1], [1], [0], [0], [0, 0, 1, 0], [], []>} : vector<8x8xbf16>, vector<8x8xbf16>, vector<8x8xf32> -> vector<8x8xf32>
    %cst_22 = arith.constant dense<0xFF800000> : vector<8xf32>
    %32 = vector.multi_reduction <maximumf>, %31, %cst_22 [1] : vector<8x8xf32> to vector<8xf32>
    %33 = vector.shape_cast %32 : vector<8xf32> to vector<8x1xf32>
    %34 = vector.broadcast %33 : vector<8x1xf32> to vector<8x8xf32>
    %35 = arith.subf %31, %34 : vector<8x8xf32>
    %36 = math.exp %35 : vector<8x8xf32>
    %cst_23 = arith.constant dense<0.000000e+00> : vector<8xf32>
    %37 = vector.multi_reduction <add>, %36, %cst_23 [1] : vector<8x8xf32> to vector<8xf32>
    %38 = vector.shape_cast %37 : vector<8xf32> to vector<8x1xf32>
    %39 = tpu.reciprocal %38 {approx = true} : vector<8x1xf32> -> vector<8x1xf32>
    %40 = vector.broadcast %39 : vector<8x1xf32> to vector<8x8xf32>
    %41 = arith.mulf %36, %40 : vector<8x8xf32>
    %42 = arith.truncf %41 : vector<8x8xf32> to vector<8x8xbf16>
    %cst_24 = arith.constant dense<0.000000e+00> : vector<8x8xf32>
    %43 = tpu.matmul %42, %30, %cst_24 {dimension_numbers = #tpu.dot_dimension_numbers<[1], [0], [0], [1], [0, 0, 1, 1], [], []>} : vector<8x8xbf16>, vector<8x8xbf16>, vector<8x8xf32> -> vector<8x8xf32>
    %44 = arith.truncf %43 : vector<8x8xf32> to vector<8x8xbf16>
    %c0_25 = arith.constant 0 : index
    %c8_26 = arith.constant 8 : index
    %45 = vector.load %arg8[%c0_25, %c8_26] : memref<16x32xbf16, #tpu.memory_space<vmem>>, vector<8x8xbf16>
    tpu.vector_store %arg8[%c0_25, %c8_26], %44 {strides = array<i32>} : memref<16x32xbf16, #tpu.memory_space<vmem>>, vector<8x8xbf16>,
    %c0_27 = arith.constant 0 : index
    %c16 = arith.constant 16 : index
    %46 = vector.load %arg7[%c0_27, %c16] : memref<16x96xbf16, #tpu.memory_space<vmem>>, vector<8x8xbf16>
    %c0_28 = arith.constant 0 : index
    %c48 = arith.constant 48 : index
    %47 = vector.load %arg7[%c0_28, %c48] : memref<16x96xbf16, #tpu.memory_space<vmem>>, vector<8x8xbf16>
    %c0_29 = arith.constant 0 : index
    %c80 = arith.constant 80 : index
    %48 = vector.load %arg7[%c0_29, %c80] : memref<16x96xbf16, #tpu.memory_space<vmem>>, vector<8x8xbf16>
    %cst_30 = arith.constant dense<0.000000e+00> : vector<8x8xf32>
    %49 = tpu.matmul %46, %47, %cst_30 {dimension_numbers = #tpu.dot_dimension_numbers<[1], [1], [0], [0], [0, 0, 1, 0], [], []>} : vector<8x8xbf16>, vector<8x8xbf16>, vector<8x8xf32> -> vector<8x8xf32>
    %cst_31 = arith.constant dense<0xFF800000> : vector<8xf32>
    %50 = vector.multi_reduction <maximumf>, %49, %cst_31 [1] : vector<8x8xf32> to vector<8xf32>
    %51 = vector.shape_cast %50 : vector<8xf32> to vector<8x1xf32>
    %52 = vector.broadcast %51 : vector<8x1xf32> to vector<8x8xf32>
    %53 = arith.subf %49, %52 : vector<8x8xf32>
    %54 = math.exp %53 : vector<8x8xf32>
    %cst_32 = arith.constant dense<0.000000e+00> : vector<8xf32>
    %55 = vector.multi_reduction <add>, %54, %cst_32 [1] : vector<8x8xf32> to vector<8xf32>
    %56 = vector.shape_cast %55 : vector<8xf32> to vector<8x1xf32>
    %57 = tpu.reciprocal %56 {approx = true} : vector<8x1xf32> -> vector<8x1xf32>
    %58 = vector.broadcast %57 : vector<8x1xf32> to vector<8x8xf32>
    %59 = arith.mulf %54, %58 : vector<8x8xf32>
    %60 = arith.truncf %59 : vector<8x8xf32> to vector<8x8xbf16>
    %cst_33 = arith.constant dense<0.000000e+00> : vector<8x8xf32>
    %61 = tpu.matmul %60, %48, %cst_33 {dimension_numbers = #tpu.dot_dimension_numbers<[1], [0], [0], [1], [0, 0, 1, 1], [], []>} : vector<8x8xbf16>, vector<8x8xbf16>, vector<8x8xf32> -> vector<8x8xf32>
    %62 = arith.truncf %61 : vector<8x8xf32> to vector<8x8xbf16>
    %c0_34 = arith.constant 0 : index
    %c16_35 = arith.constant 16 : index
    %63 = vector.load %arg8[%c0_34, %c16_35] : memref<16x32xbf16, #tpu.memory_space<vmem>>, vector<8x8xbf16>
    tpu.vector_store %arg8[%c0_34, %c16_35], %62 {strides = array<i32>} : memref<16x32xbf16, #tpu.memory_space<vmem>>, vector<8x8xbf16>,
    %c0_36 = arith.constant 0 : index
    %c24 = arith.constant 24 : index
    %64 = vector.load %arg7[%c0_36, %c24] : memref<16x96xbf16, #tpu.memory_space<vmem>>, vector<8x8xbf16>
    %c0_37 = arith.constant 0 : index
    %c56 = arith.constant 56 : index
    %65 = vector.load %arg7[%c0_37, %c56] : memref<16x96xbf16, #tpu.memory_space<vmem>>, vector<8x8xbf16>
    %c0_38 = arith.constant 0 : index
    %c88 = arith.constant 88 : index
    %66 = vector.load %arg7[%c0_38, %c88] : memref<16x96xbf16, #tpu.memory_space<vmem>>, vector<8x8xbf16>
    %cst_39 = arith.constant dense<0.000000e+00> : vector<8x8xf32>
    %67 = tpu.matmul %64, %65, %cst_39 {dimension_numbers = #tpu.dot_dimension_numbers<[1], [1], [0], [0], [0, 0, 1, 0], [], []>} : vector<8x8xbf16>, vector<8x8xbf16>, vector<8x8xf32> -> vector<8x8xf32>
    %cst_40 = arith.constant dense<0xFF800000> : vector<8xf32>
    %68 = vector.multi_reduction <maximumf>, %67, %cst_40 [1] : vector<8x8xf32> to vector<8xf32>
    %69 = vector.shape_cast %68 : vector<8xf32> to vector<8x1xf32>
    %70 = vector.broadcast %69 : vector<8x1xf32> to vector<8x8xf32>
    %71 = arith.subf %67, %70 : vector<8x8xf32>
    %72 = math.exp %71 : vector<8x8xf32>
    %cst_41 = arith.constant dense<0.000000e+00> : vector<8xf32>
    %73 = vector.multi_reduction <add>, %72, %cst_41 [1] : vector<8x8xf32> to vector<8xf32>
    %74 = vector.shape_cast %73 : vector<8xf32> to vector<8x1xf32>
    %75 = tpu.reciprocal %74 {approx = true} : vector<8x1xf32> -> vector<8x1xf32>
    %76 = vector.broadcast %75 : vector<8x1xf32> to vector<8x8xf32>
    %77 = arith.mulf %72, %76 : vector<8x8xf32>
    %78 = arith.truncf %77 : vector<8x8xf32> to vector<8x8xbf16>
    %cst_42 = arith.constant dense<0.000000e+00> : vector<8x8xf32>
    %79 = tpu.matmul %78, %66, %cst_42 {dimension_numbers = #tpu.dot_dimension_numbers<[1], [0], [0], [1], [0, 0, 1, 1], [], []>} : vector<8x8xbf16>, vector<8x8xbf16>, vector<8x8xf32> -> vector<8x8xf32>
    %80 = arith.truncf %79 : vector<8x8xf32> to vector<8x8xbf16>
    %c0_43 = arith.constant 0 : index
    %c24_44 = arith.constant 24 : index
    %81 = vector.load %arg8[%c0_43, %c24_44] : memref<16x32xbf16, #tpu.memory_space<vmem>>, vector<8x8xbf16>
    tpu.vector_store %arg8[%c0_43, %c24_44], %80 {strides = array<i32>} : memref<16x32xbf16, #tpu.memory_space<vmem>>, vector<8x8xbf16>,
    %c8_45 = arith.constant 8 : index
    %c0_46 = arith.constant 0 : index
    %82 = vector.load %arg7[%c8_45, %c0_46] : memref<16x96xbf16, #tpu.memory_space<vmem>>, vector<8x8xbf16>
    %c8_47 = arith.constant 8 : index
    %c32_48 = arith.constant 32 : index
    %83 = vector.load %arg7[%c8_47, %c32_48] : memref<16x96xbf16, #tpu.memory_space<vmem>>, vector<8x8xbf16>
    %c8_49 = arith.constant 8 : index
    %c64_50 = arith.constant 64 : index
    %84 = vector.load %arg7[%c8_49, %c64_50] : memref<16x96xbf16, #tpu.memory_space<vmem>>, vector<8x8xbf16>
    %cst_51 = arith.constant dense<0.000000e+00> : vector<8x8xf32>
    %85 = tpu.matmul %82, %83, %cst_51 {dimension_numbers = #tpu.dot_dimension_numbers<[1], [1], [0], [0], [0, 0, 1, 0], [], []>} : vector<8x8xbf16>, vector<8x8xbf16>, vector<8x8xf32> -> vector<8x8xf32>
    %cst_52 = arith.constant dense<0xFF800000> : vector<8xf32>
    %86 = vector.multi_reduction <maximumf>, %85, %cst_52 [1] : vector<8x8xf32> to vector<8xf32>
    %87 = vector.shape_cast %86 : vector<8xf32> to vector<8x1xf32>
    %88 = vector.broadcast %87 : vector<8x1xf32> to vector<8x8xf32>
    %89 = arith.subf %85, %88 : vector<8x8xf32>
    %90 = math.exp %89 : vector<8x8xf32>
    %cst_53 = arith.constant dense<0.000000e+00> : vector<8xf32>
    %91 = vector.multi_reduction <add>, %90, %cst_53 [1] : vector<8x8xf32> to vector<8xf32>
    %92 = vector.shape_cast %91 : vector<8xf32> to vector<8x1xf32>
    %93 = tpu.reciprocal %92 {approx = true} : vector<8x1xf32> -> vector<8x1xf32>
    %94 = vector.broadcast %93 : vector<8x1xf32> to vector<8x8xf32>
    %95 = arith.mulf %90, %94 : vector<8x8xf32>
    %96 = arith.truncf %95 : vector<8x8xf32> to vector<8x8xbf16>
    %cst_54 = arith.constant dense<0.000000e+00> : vector<8x8xf32>
    %97 = tpu.matmul %96, %84, %cst_54 {dimension_numbers = #tpu.dot_dimension_numbers<[1], [0], [0], [1], [0, 0, 1, 1], [], []>} : vector<8x8xbf16>, vector<8x8xbf16>, vector<8x8xf32> -> vector<8x8xf32>
    %98 = arith.truncf %97 : vector<8x8xf32> to vector<8x8xbf16>
    %c8_55 = arith.constant 8 : index
    %c0_56 = arith.constant 0 : index
    %99 = vector.load %arg8[%c8_55, %c0_56] : memref<16x32xbf16, #tpu.memory_space<vmem>>, vector<8x8xbf16>
    tpu.vector_store %arg8[%c8_55, %c0_56], %98 {strides = array<i32>} : memref<16x32xbf16, #tpu.memory_space<vmem>>, vector<8x8xbf16>,
    %c8_57 = arith.constant 8 : index
    %c8_58 = arith.constant 8 : index
    %100 = vector.load %arg7[%c8_57, %c8_58] : memref<16x96xbf16, #tpu.memory_space<vmem>>, vector<8x8xbf16>
    %c8_59 = arith.constant 8 : index
    %c40_60 = arith.constant 40 : index
    %101 = vector.load %arg7[%c8_59, %c40_60] : memref<16x96xbf16, #tpu.memory_space<vmem>>, vector<8x8xbf16>
    %c8_61 = arith.constant 8 : index
    %c72_62 = arith.constant 72 : index
    %102 = vector.load %arg7[%c8_61, %c72_62] : memref<16x96xbf16, #tpu.memory_space<vmem>>, vector<8x8xbf16>
    %cst_63 = arith.constant dense<0.000000e+00> : vector<8x8xf32>
    %103 = tpu.matmul %100, %101, %cst_63 {dimension_numbers = #tpu.dot_dimension_numbers<[1], [1], [0], [0], [0, 0, 1, 0], [], []>} : vector<8x8xbf16>, vector<8x8xbf16>, vector<8x8xf32> -> vector<8x8xf32>
    %cst_64 = arith.constant dense<0xFF800000> : vector<8xf32>
    %104 = vector.multi_reduction <maximumf>, %103, %cst_64 [1] : vector<8x8xf32> to vector<8xf32>
    %105 = vector.shape_cast %104 : vector<8xf32> to vector<8x1xf32>
    %106 = vector.broadcast %105 : vector<8x1xf32> to vector<8x8xf32>
    %107 = arith.subf %103, %106 : vector<8x8xf32>
    %108 = math.exp %107 : vector<8x8xf32>
    %cst_65 = arith.constant dense<0.000000e+00> : vector<8xf32>
    %109 = vector.multi_reduction <add>, %108, %cst_65 [1] : vector<8x8xf32> to vector<8xf32>
    %110 = vector.shape_cast %109 : vector<8xf32> to vector<8x1xf32>
    %111 = tpu.reciprocal %110 {approx = true} : vector<8x1xf32> -> vector<8x1xf32>
    %112 = vector.broadcast %111 : vector<8x1xf32> to vector<8x8xf32>
    %113 = arith.mulf %108, %112 : vector<8x8xf32>
    %114 = arith.truncf %113 : vector<8x8xf32> to vector<8x8xbf16>
    %cst_66 = arith.constant dense<0.000000e+00> : vector<8x8xf32>
    %115 = tpu.matmul %114, %102, %cst_66 {dimension_numbers = #tpu.dot_dimension_numbers<[1], [0], [0], [1], [0, 0, 1, 1], [], []>} : vector<8x8xbf16>, vector<8x8xbf16>, vector<8x8xf32> -> vector<8x8xf32>
    %116 = arith.truncf %115 : vector<8x8xf32> to vector<8x8xbf16>
    %c8_67 = arith.constant 8 : index
    %c8_68 = arith.constant 8 : index
    %117 = vector.load %arg8[%c8_67, %c8_68] : memref<16x32xbf16, #tpu.memory_space<vmem>>, vector<8x8xbf16>
    tpu.vector_store %arg8[%c8_67, %c8_68], %116 {strides = array<i32>} : memref<16x32xbf16, #tpu.memory_space<vmem>>, vector<8x8xbf16>,
    %c8_69 = arith.constant 8 : index
    %c16_70 = arith.constant 16 : index
    %118 = vector.load %arg7[%c8_69, %c16_70] : memref<16x96xbf16, #tpu.memory_space<vmem>>, vector<8x8xbf16>
    %c8_71 = arith.constant 8 : index
    %c48_72 = arith.constant 48 : index
    %119 = vector.load %arg7[%c8_71, %c48_72] : memref<16x96xbf16, #tpu.memory_space<vmem>>, vector<8x8xbf16>
    %c8_73 = arith.constant 8 : index
    %c80_74 = arith.constant 80 : index
    %120 = vector.load %arg7[%c8_73, %c80_74] : memref<16x96xbf16, #tpu.memory_space<vmem>>, vector<8x8xbf16>
    %cst_75 = arith.constant dense<0.000000e+00> : vector<8x8xf32>
    %121 = tpu.matmul %118, %119, %cst_75 {dimension_numbers = #tpu.dot_dimension_numbers<[1], [1], [0], [0], [0, 0, 1, 0], [], []>} : vector<8x8xbf16>, vector<8x8xbf16>, vector<8x8xf32> -> vector<8x8xf32>
    %cst_76 = arith.constant dense<0xFF800000> : vector<8xf32>
    %122 = vector.multi_reduction <maximumf>, %121, %cst_76 [1] : vector<8x8xf32> to vector<8xf32>
    %123 = vector.shape_cast %122 : vector<8xf32> to vector<8x1xf32>
    %124 = vector.broadcast %123 : vector<8x1xf32> to vector<8x8xf32>
    %125 = arith.subf %121, %124 : vector<8x8xf32>
    %126 = math.exp %125 : vector<8x8xf32>
    %cst_77 = arith.constant dense<0.000000e+00> : vector<8xf32>
    %127 = vector.multi_reduction <add>, %126, %cst_77 [1] : vector<8x8xf32> to vector<8xf32>
    %128 = vector.shape_cast %127 : vector<8xf32> to vector<8x1xf32>
    %129 = tpu.reciprocal %128 {approx = true} : vector<8x1xf32> -> vector<8x1xf32>
    %130 = vector.broadcast %129 : vector<8x1xf32> to vector<8x8xf32>
    %131 = arith.mulf %126, %130 : vector<8x8xf32>
    %132 = arith.truncf %131 : vector<8x8xf32> to vector<8x8xbf16>
    %cst_78 = arith.constant dense<0.000000e+00> : vector<8x8xf32>
    %133 = tpu.matmul %132, %120, %cst_78 {dimension_numbers = #tpu.dot_dimension_numbers<[1], [0], [0], [1], [0, 0, 1, 1], [], []>} : vector<8x8xbf16>, vector<8x8xbf16>, vector<8x8xf32> -> vector<8x8xf32>
    %134 = arith.truncf %133 : vector<8x8xf32> to vector<8x8xbf16>
    %c8_79 = arith.constant 8 : index
    %c16_80 = arith.constant 16 : index
    %135 = vector.load %arg8[%c8_79, %c16_80] : memref<16x32xbf16, #tpu.memory_space<vmem>>, vector<8x8xbf16>
    tpu.vector_store %arg8[%c8_79, %c16_80], %134 {strides = array<i32>} : memref<16x32xbf16, #tpu.memory_space<vmem>>, vector<8x8xbf16>,
    %c8_81 = arith.constant 8 : index
    %c24_82 = arith.constant 24 : index
    %136 = vector.load %arg7[%c8_81, %c24_82] : memref<16x96xbf16, #tpu.memory_space<vmem>>, vector<8x8xbf16>
    %c8_83 = arith.constant 8 : index
    %c56_84 = arith.constant 56 : index
    %137 = vector.load %arg7[%c8_83, %c56_84] : memref<16x96xbf16, #tpu.memory_space<vmem>>, vector<8x8xbf16>
    %c8_85 = arith.constant 8 : index
    %c88_86 = arith.constant 88 : index
    %138 = vector.load %arg7[%c8_85, %c88_86] : memref<16x96xbf16, #tpu.memory_space<vmem>>, vector<8x8xbf16>
    %cst_87 = arith.constant dense<0.000000e+00> : vector<8x8xf32>
    %139 = tpu.matmul %136, %137, %cst_87 {dimension_numbers = #tpu.dot_dimension_numbers<[1], [1], [0], [0], [0, 0, 1, 0], [], []>} : vector<8x8xbf16>, vector<8x8xbf16>, vector<8x8xf32> -> vector<8x8xf32>
    %cst_88 = arith.constant dense<0xFF800000> : vector<8xf32>
    %140 = vector.multi_reduction <maximumf>, %139, %cst_88 [1] : vector<8x8xf32> to vector<8xf32>
    %141 = vector.shape_cast %140 : vector<8xf32> to vector<8x1xf32>
    %142 = vector.broadcast %141 : vector<8x1xf32> to vector<8x8xf32>
    %143 = arith.subf %139, %142 : vector<8x8xf32>
    %144 = math.exp %143 : vector<8x8xf32>
    %cst_89 = arith.constant dense<0.000000e+00> : vector<8xf32>
    %145 = vector.multi_reduction <add>, %144, %cst_89 [1] : vector<8x8xf32> to vector<8xf32>
    %146 = vector.shape_cast %145 : vector<8xf32> to vector<8x1xf32>
    %147 = tpu.reciprocal %146 {approx = true} : vector<8x1xf32> -> vector<8x1xf32>
    %148 = vector.broadcast %147 : vector<8x1xf32> to vector<8x8xf32>
    %149 = arith.mulf %144, %148 : vector<8x8xf32>
    %150 = arith.truncf %149 : vector<8x8xf32> to vector<8x8xbf16>
    %cst_90 = arith.constant dense<0.000000e+00> : vector<8x8xf32>
    %151 = tpu.matmul %150, %138, %cst_90 {dimension_numbers = #tpu.dot_dimension_numbers<[1], [0], [0], [1], [0, 0, 1, 1], [], []>} : vector<8x8xbf16>, vector<8x8xbf16>, vector<8x8xf32> -> vector<8x8xf32>
    %152 = arith.truncf %151 : vector<8x8xf32> to vector<8x8xbf16>
    %c8_91 = arith.constant 8 : index
    %c24_92 = arith.constant 24 : index
    %153 = vector.load %arg8[%c8_91, %c24_92] : memref<16x32xbf16, #tpu.memory_space<vmem>>, vector<8x8xbf16>
    tpu.vector_store %arg8[%c8_91, %c24_92], %152 {strides = array<i32>} : memref<16x32xbf16, #tpu.memory_space<vmem>>, vector<8x8xbf16>,
    %c0_93 = arith.constant 0 : index
    %c0_94 = arith.constant 0 : index
    %154 = vector.load %arg8[%c0_93, %c0_94] : memref<16x32xbf16, #tpu.memory_space<vmem>>, vector<16x32xbf16>
    %c0_95 = arith.constant 0 : index
    %c0_96 = arith.constant 0 : index
    %155 = vector.load %arg4[%c0_95, %c0_96] : memref<32x32xbf16, #tpu.memory_space<vmem>>, vector<32x32xbf16>
    %cst_97 = arith.constant dense<0.000000e+00> : vector<16x32xf32>
    %156 = tpu.matmul %154, %155, %cst_97 {dimension_numbers = #tpu.dot_dimension_numbers<[1], [0], [0], [1], [0, 0, 1, 1], [], []>} : vector<16x32xbf16>, vector<32x32xbf16>, vector<16x32xf32> -> vector<16x32xf32>
    %c0_98 = arith.constant 0 : index
    %c0_99 = arith.constant 0 : index
    %157 = vector.load %arg5[%c0_98, %c0_99] : memref<1x32xf32, #tpu.memory_space<vmem>>, vector<1x32xf32>
    %158 = vector.broadcast %157 : vector<1x32xf32> to vector<16x32xf32>
    %159 = arith.addf %156, %158 : vector<16x32xf32>
    %160 = vector.shape_cast %159 : vector<16x32xf32> to vector<2x8x32xf32>
    %c0_100 = arith.constant 0 : index
    %c0_101 = arith.constant 0 : index
    %c0_102 = arith.constant 0 : index
    %161 = vector.load %arg6[%c0_100, %c0_101, %c0_102] : memref<2x8x32xf32, #tpu.memory_space<vmem>>, vector<2x8x32xf32>
    tpu.vector_store %arg6[%c0_100, %c0_101, %c0_102], %160 {strides = array<i32>} : memref<2x8x32xf32, #tpu.memory_space<vmem>>, vector<2x8x32xf32>,
    return
  }
  func.func @transform_0(%arg0: i32) -> (i32, i32, i32) {
    %c0_i32 = arith.constant 0 : i32
    %c0_i32_0 = arith.constant 0 : i32
    %c0_i32_1 = arith.constant 0 : i32
    return %arg0, %c0_i32, %c0_i32_0 : i32, i32, i32
  }
  func.func @transform_1(%arg0: i32) -> (i32, i32) {
    %c0_i32 = arith.constant 0 : i32
    %c0_i32_0 = arith.constant 0 : i32
    %c0_i32_1 = arith.constant 0 : i32
    return %c0_i32, %c0_i32_0 : i32, i32
  }
  func.func @transform_2(%arg0: i32) -> (i32, i32) {
    %c0_i32 = arith.constant 0 : i32
    %c0_i32_0 = arith.constant 0 : i32
    %c0_i32_1 = arith.constant 0 : i32
    return %c0_i32, %c0_i32_0 : i32, i32
  }
  func.func @transform_3(%arg0: i32) -> (i32, i32) {
    %c0_i32 = arith.constant 0 : i32
    %c0_i32_0 = arith.constant 0 : i32
    %c0_i32_1 = arith.constant 0 : i32
    return %c0_i32, %c0_i32_0 : i32, i32
  }
  func.func @transform_4(%arg0: i32) -> (i32, i32) {
    %c0_i32 = arith.constant 0 : i32
    %c0_i32_0 = arith.constant 0 : i32
    %c0_i32_1 = arith.constant 0 : i32
    return %c0_i32, %c0_i32_0 : i32, i32
  }
  func.func @transform_5(%arg0: i32) -> (i32, i32, i32) {
    %c0_i32 = arith.constant 0 : i32
    %c0_i32_0 = arith.constant 0 : i32
    %c0_i32_1 = arith.constant 0 : i32
    return %arg0, %c0_i32, %c0_i32_0 : i32, i32, i32
  }
}

</mosaic_0001>

<bundles_post_ra>
// kernel: tpu_custom_call.1
= control target key start
LH: loop header
LB: loop body
LE: loop exit
PB: predicated region body
PF: predicated region fallthrough
CT: control target
= control target key end

     0   :  { %10 = vsyncpa [#allocation5], 0  ;;  %s1109_s0 = inlined_call_operand.hbm [shape: f32[2,8,32], index: 0, kind: input, shape index: {}]   ;;  %s1110_s1 = inlined_call_operand.hbm [shape: bf16[32,96], index: 1, kind: input, shape index: {}]   ;;  %s1111_s2 = inlined_call_operand.vmem [shape: f32[1,96], index: 2, kind: input, shape index: {}]   ;;  %s1112_s3 = inlined_call_operand.hbm [shape: bf16[32,32], index: 3, kind: input, shape index: {}]   ;;  %s1113_s4 = inlined_call_operand.vmem [shape: f32[1,32], index: 4, kind: input, shape index: {}]   ;;  %s1114_s5 = inlined_call_operand.hbm [shape: f32[2,8,32], index: 5, kind: output, shape index: {}]  }
   0x1   :  { %11 = vsyncpa [#allocation8], 0  ;;  %s30_s20 = sshll.u32 %s1110_s1, 4  ;;  %s31_s20 = int_to_ptr.hbm [resolvable:$true] %s30_s20 }
   0x2   :  { %12 = vsyncpa [#allocation6], 0  ;;  %s902_s21 = smov [#allocation7]   ;;  %s17_s25 = sshll.u32 %s1109_s0, 4  ;;  %s18_s25 = int_to_ptr.hbm [resolvable:$true] %s17_s25 }
   0x3   :  { %s32_s22 = sshll.u32 %s902_s21, 4  ;;  %s903_s26 = smov 64   ;;  %s33_s22 = int_to_ptr.vmem [resolvable:$true] %s32_s22 }
   0x4   :  { %s904_s27 = smov 4   ;;  %s905_s28 = smov [#allocation4]  }
   0x5   :  { %38 = dma.hbm_to_vmem [thread:$0]  %s31_s20, 256, %s33_s22, [#allocation8], %s903_s26, %s903_s26, %s904_s27  }
   0x6   :  { %s19_s29 = sshll.u32 %s905_s28, 4  ;;  %s906_s30 = smov 128   ;;  %s20_s29 = int_to_ptr.vmem [resolvable:$true] %s19_s29 }
   0x7   :  { %s907_s1 = smov 8   ;;  %s45_s8 = sshll.u32 %s1112_s3, 4  ;;  %s46_s8 = int_to_ptr.hbm [resolvable:$true] %s45_s8 }
   0x8   :  { %25 = dma.hbm_to_vmem [thread:$0]  %s18_s25, 256, %s20_s29, [#allocation5], %s906_s30, %s906_s30, %s907_s1  }
   0x9   :  { %s908_s0 = smov [#allocation9]  }
   0xa   :  { %s47_s9 = sshll.u32 %s908_s0, 4  ;;  %s48_s9 = int_to_ptr.vmem [resolvable:$true] %s47_s9 }
   0xb   :  { %53 = dma.hbm_to_vmem [thread:$0]  %s46_s8, 256, %s48_s9, [#allocation8], %s903_s26, %s903_s26, %s904_s27  }
   0xc   :  { %896 = dma.done.wait [#allocation5], 256  }
   0xd   :  { %897 = vsyncadd [#allocation5], 4294967040 }
   0xe   :  { %898 = dma.done.wait [#allocation8], 512  }
   0xf   :  { %899 = vsyncadd [#allocation8], 4294966784  ;;  %v742_v0 = vld [vmem:[#allocation7 + $0x8] sm:$0xff]  ;;  %v741_v1 = vld [vmem:[#allocation7] sm:$0xff]  ;;  %vm92_vm0 = vcmask 261120   ;;  %vm112_vm1 = vcmask 781312  }
  0x10   :  { %102 = vmatpush.bf16.msra.mxu0 %v742_v0  ;;  %v69_v2 = vld [vmem:[#allocation4] sm:$0xff]  ;;  %v70_v3 = vld [vmem:[#allocation4 + $0x8] sm:$0xff]  ;;  %v766_v5 = vld [vmem:[%s1111_s2] ss:$0 sm:$0xff]  ;;  %s909_s11 = smov 96   ;;  %s910_s2 = smov 104  }
  0x11   :  { %v71_v4 = vpack.c.bf16 %v70_v3, %v69_v2  ;;  %s911_s12 = smov 120   ;;  %s912_s13 = smov 88   ;;  %vm121_vm2 = vcmask 64512   ;;  %vm158_vm3 = vcmask 1043456   ;;  %vm176_vm4 = vcmask 60416  }
  0x12   :  { %s913_s14 = smov 80   ;;  %s914_s15 = smov 72   ;;  %vm243_vm5 = vcmask 126016   ;;  %vm310_vm6 = vcmask 191616   ;;  %vm377_vm7 = vcmask 257216  }
  0x13   :  { %s915_s16 = smov 112   ;;  %s916_s17 = smov 56  }
  0x14   :  { %103 = vmatpush.bf16.msra.mxu0 %v741_v1  ;;  %s917_s18 = smov 48   ;;  %s918_s19 = smov 40  }
  0x15   :  { %s919_s20 = smov 16   ;;  %s920_s21 = smov 24  }
  0x16   :  { %s921_s24 = smov [#allocation10]   ;;  %s689_s28 = sshll.u32 %s1114_s5, 4  ;;  %s690_s28 = int_to_ptr.hbm [resolvable:$true] %s689_s28 }
  0x17   :  { %711 = vmatmul.msk.bf16.vlgmr.msra.gmra.mxu0 %vm92_vm0, %v71_v4  ;;  %s687_s25 = sshll.u32 %s921_s24, 4  ;;  %s688_s25 = int_to_ptr.vmem [resolvable:$true] %s687_s25 }
  0x94   :  { %v105_v6 = vpop.f32.mrf.mxu0 }
  0x95   :  { %v106_v7 = vadd.f32 %v766_v5, %v105_v6 }
  0x97   :  { %v110_v8 = vpack.c.bf16 %v106_v7, %v106_v7 }
  0x99   :  { %113 = vst.msk [vmem:[#allocation2] sm:$0xf] %vm112_vm1, %v110_v8 }
  0x9c   :  { %v107_v9 = vpop.f32.mrf.mxu0 }
  0x9d   :  { %v108_v10 = vadd.f32 %v766_v5, %v107_v9 }
  0x9f   :  { %v111_v11 = vpack.c.bf16 %v108_v10, %v108_v10 }
  0xa0   :  { %v115_v12 = vld [vmem:[#allocation2] sm:$0xf] }
  0xa1   :  { %114 = vst.msk [vmem:[#allocation2 + $0x4] sm:$0xf] %vm112_vm1, %v111_v11  ;;  %v117_v13 = vunpack.c.l.b16 %v115_v12 }
  0xa3   :  { %v972_v14 = vpack.c.b16 %v117_v13, %v117_v13 }
  0xa5   :  { %119 = vrot.lane.b32.xlu0 %v972_v14, %s909_s11 }
  0xa8   :  { %v312_v15 = vld [vmem:[#allocation2] sm:$0xff]  }
  0xa9   :  { %v178_v16 = vld [vmem:[#allocation2] sm:$0xff]   ;;  %v314_v17 = vunpack.c.l.b16 %v312_v15  ;;  %v441_v23 = vunpack.c.h.b16 %v312_v15 }
  0xaa   :  { %v180_v18 = vunpack.c.l.b16 %v178_v16  ;;  %v245_v21 = vld [vmem:[#allocation2] sm:$0xff]   ;;  %v573_v29 = vunpack.c.h.b16 %v178_v16 }
  0xab   :  { %v976_v19 = vpack.c.b16 %v314_v17, %v314_v17  ;;  %v247_v22 = vunpack.c.l.b16 %v245_v21  ;;  %v981_v25 = vpack.c.b16 %v441_v23, %v441_v23  ;;  %v379_v26 = vld [vmem:[#allocation2 + $0x4] sm:$0xf]  ;;  %v507_v30 = vunpack.c.h.b16 %v245_v21 }
  0xac   :  { %v181_v20 = vpack.c.b16 %v180_v18, %v180_v18  ;;  %v381_v27 = vunpack.c.l.b16 %v379_v26  ;;  %v992_v31 = vpack.c.b16 %v573_v29, %v573_v29 }
  0xad   :  { %316 = vrot.lane.b32.xlu2 %v976_v19, %s910_s2  ;;  %v979_v24 = vpack.c.b16 %v247_v22, %v247_v22  ;;  %v994_v32 = vpack.c.b16 %v507_v30, %v507_v30 }
  0xae   :  { %182 = vrot.lane.b32.xlu1 %v181_v20, %s911_s12  ;;  %184 = vrot.lane.b32.xlu0 %v181_v20, %s912_s13  ;;  %v986_v28 = vpack.c.b16 %v381_v27, %v381_v27 }
  0xb5   :  { %251 = vrot.lane.b32.xlu2 %v979_v24, %s913_s14 }
  0xb6   :  { %318 = vrot.lane.b32.xlu1 %v976_v19, %s914_s15  ;;  %445 = vrot.lane.b32.xlu0 %v981_v25, %s912_s13 }
  0xbd   :  { %443 = vrot.lane.b32.xlu2 %v981_v25, %s911_s12 }
  0xbe   :  { %249 = vrot.lane.b32.xlu1 %v979_v24, %s915_s16  ;;  %383 = vrot.lane.b32.xlu0 %v986_v28, %s909_s11 }
  0xc5   :  { %575 = vrot.lane.b32.xlu2 %v992_v31, %s910_s2 }
  0xc6   :  { %577 = vrot.lane.b32.xlu1 %v992_v31, %s914_s15  ;;  %511 = vrot.lane.b32.xlu0 %v994_v32, %s913_s14 }
  0xce   :  { %509 = vrot.lane.b32.xlu1 %v994_v32, %s915_s16 }
  0xd6   :  { %217 = vrot.lane.b32.xlu1 %v181_v20, %s916_s17 }
 0x107   :  { %v317_v33 = vpop.permute.xlu2 %316 }
 0x10f   :  { %v252_v34 = vpop.permute.xlu2 %251 }
 0x110   :  { %v257_v35 = vsel %vm121_vm2, %v252_v34, 0 }
 0x111   :  { %266 = vmatpush.bf16.xpose.msrb.mxu0 %v257_v35 }
 0x117   :  { %v120_v36 = vpop.permute.xlu0 %119  ;;  %v444_v52 = vpop.permute.xlu2 %443 }
 0x118   :  { %v126_v37 = vsel %vm121_vm2, %v120_v36, 0 }
 0x119   :  { %135 = vmatpush.bf16.xpose.msra.mxu1 %v126_v37 }
 0x11f   :  { %v576_v54 = vpop.permute.xlu2 %575 }
 0x120   :  { %v183_v38 = vpop.permute.xlu1 %182  ;;  %v185_v39 = vpop.permute.xlu0 %184  ;;  %712 = vmatmul.msk.bf16.vlgmr.msra.gmra.mxu1 %vm121_vm2, %v115_v12 }
 0x121   :  { %v190_v40 = vsel %vm121_vm2, %v185_v39, 0 }
 0x122   :  { %199 = vmatpush.bf16.xpose.msra.mxu3 %v190_v40 }
 0x128   :  { %v319_v41 = vpop.permute.xlu1 %318  ;;  %v446_v43 = vpop.permute.xlu0 %445 }
 0x129   :  { %v324_v42 = vsel %vm121_vm2, %v319_v41, 0  ;;  %v451_v44 = vsel %vm121_vm2, %v446_v43, 0  ;;  %714 = vmatmul.msk.bf16.vlgmr.msra.gmra.mxu3 %vm121_vm2, %v183_v38 }
 0x12a   :  { %333 = vmatpush.bf16.xpose.msrb.mxu3 %v324_v42 }
 0x130   :  { %v250_v45 = vpop.permute.xlu1 %249  ;;  %v384_v46 = vpop.permute.xlu0 %383 }
 0x131   :  { %716 = vmatmul.msk.bf16.vlgmr.msrb.gmra.mxu0 %vm121_vm2, %v250_v45  ;;  %v389_v47 = vsel %vm121_vm2, %v384_v46, 0 }
 0x132   :  { %460 = vmatpush.bf16.xpose.msra.mxu3 %v451_v44  ;;  %398 = vmatpush.bf16.xpose.msra.mxu0 %v389_v47 }
 0x138   :  { %v578_v48 = vpop.permute.xlu1 %577  ;;  %v512_v50 = vpop.permute.xlu0 %511 }
 0x139   :  { %v583_v49 = vsel %vm121_vm2, %v578_v48, 0  ;;  %v517_v51 = vsel %vm121_vm2, %v512_v50, 0  ;;  %718 = vmatmul.msk.bf16.vlgmr.msrb.gmra.mxu3 %vm121_vm2, %v317_v33 }
 0x13a   :  { %526 = vmatpush.bf16.xpose.msrb.mxu0 %v517_v51  ;;  %592 = vmatpush.bf16.xpose.msrb.mxu3 %v583_v49 }
 0x140   :  { %v510_v53 = vpop.permute.xlu1 %509 }
 0x141   :  { %720 = vmatmul.msk.bf16.vlgmr.msra.gmra.mxu0 %vm121_vm2, %v379_v26 }
 0x148   :  { %v218_v29 = vpop.permute.xlu1 %217 }
 0x149   :  { %722 = vmatmul.msk.bf16.vlgmr.msra.gmra.mxu3 %vm121_vm2, %v444_v52  ;;  %v223_v34 = vsel %vm158_vm3, %v218_v29, 0 }
 0x151   :  { %724 = vmatmul.msk.bf16.vlgmr.msrb.gmra.mxu0 %vm121_vm2, %v510_v53 }
 0x159   :  { %726 = vmatmul.msk.bf16.vlgmr.msrb.gmra.mxu3 %vm121_vm2, %v576_v54 }
 0x19d   :  { %v137_v55 = vpop.f32.mrf.mxu1 }
 0x19e   :  { %v141_v56 = vsel %vm121_vm2, %v137_v55, -inf }
 0x19f   :  { %142 = vmax.xlane.f32.xlu2 %v141_v56 }
 0x1a5   :  { %v139_v57 = vpop.f32.mrf.mxu1 }
 0x1ac   :  { %v201_v59 = vpop.f32.mrf.mxu3 }
 0x1ad   :  { %v205_v61 = vsel %vm121_vm2, %v201_v59, -inf }
 0x1ae   :  { %v268_v58 = vpop.f32.mrf.mxu0  ;;  %206 = vmax.xlane.f32.xlu0 %v205_v61 }
 0x1af   :  { %v272_v60 = vsel %vm121_vm2, %v268_v58, -inf }
 0x1b0   :  { %273 = vmax.xlane.f32.xlu2 %v272_v60 }
 0x1b4   :  { %v203_v63 = vpop.f32.mrf.mxu3 }
 0x1b6   :  { %v270_v62 = vpop.f32.mrf.mxu0 }
 0x1bc   :  { %v1020_v1 = vpop.f32.mrf.mxu3 }
 0x1bd   :  { %v339_v5 = vsel %vm121_vm2, %v1020_v1, -inf }
 0x1be   :  { %v400_v0 = vpop.f32.mrf.mxu0 }
 0x1bf   :  { %v404_v2 = vsel %vm121_vm2, %v400_v0, -inf }
 0x1c0   :  { %405 = vmax.xlane.f32.xlu1 %v404_v2 }
 0x1c4   :  { %v337_v4 = vpop.f32.mrf.mxu3 }
 0x1c6   :  { %v402_v3 = vpop.f32.mrf.mxu0 }
 0x1c8   :  { %153 = vrot.lane.b32.xlu2 %v972_v14, %s903_s26  ;;  %340 = vmax.xlane.f32.xlu1 %v339_v5 }
 0x1cc   :  { %v1029_v7 = vpop.f32.mrf.mxu3 }
 0x1cd   :  { %v466_v14 = vsel %vm121_vm2, %v1029_v7, -inf }
 0x1ce   :  { %v1027_v6 = vpop.f32.mrf.mxu0 }
 0x1cf   :  { %v532_v8 = vsel %vm121_vm2, %v1027_v6, -inf }
 0x1d0   :  { %533 = vmax.xlane.f32.xlu0 %v532_v8 }
 0x1d4   :  { %v464_v10 = vpop.f32.mrf.mxu3 }
 0x1d6   :  { %v530_v9 = vpop.f32.mrf.mxu0 }
 0x1dc   :  { %v594_v11 = vpop.f32.mrf.mxu3 }
 0x1dd   :  { %v598_v12 = vsel %vm121_vm2, %v594_v11, -inf }
 0x1de   :  { %599 = vmax.xlane.f32.xlu0 %v598_v12 }
 0x1e1   :  { %284 = vrot.lane.b32.xlu1 %v979_v24, %s917_s18 }
 0x1e4   :  { %v596_v13 = vpop.f32.mrf.mxu3 }
 0x1f1   :  { %467 = vmax.xlane.f32.xlu2 %v466_v14 }
 0x212   :  { %v143_v15 = vpop.xlane.xlu2 %142 }
 0x213   :  { %v144_v16 = vsub.f32 %v137_v55, %v143_v15 }
 0x215   :  { %v145_v17 = vmul.f32 1.442695, %v144_v16 }
 0x217   :  { %768 = vpow2.f32 %v145_v17 }
 0x21d   :  { %v1038_v18 = vpop.eup %768 }
 0x21e   :  { %v147_v20 = vsel %vm121_vm2, %v1038_v18, 0.0 }
 0x21f   :  { %148 = vadd.xlane.f32.xlu0 %v147_v20 }
 0x221   :  { %v207_v22 = vpop.xlane.xlu0 %206 }
 0x222   :  { %v208_v26 = vsub.f32 %v201_v59, %v207_v22 }
 0x223   :  { %v274_v21 = vpop.xlane.xlu2 %273 }
 0x224   :  { %v275_v23 = vsub.f32 %v268_v58, %v274_v21  ;;  %v209_v27 = vmul.f32 1.442695, %v208_v26 }
 0x226   :  { %v276_v24 = vmul.f32 1.442695, %v275_v23 }
 0x228   :  { %770 = vpow2.f32 %v276_v24 }
 0x229   :  { %772 = vpow2.f32 %v209_v27 }
 0x22b   :  { %v154_v30 = vpop.permute.xlu2 %153 }
 0x22c   :  { %v160_v33 = vsel %vm158_vm3, %v154_v30, 0 }
 0x22d   :  { %169 = vmatpush.bf16.msra.mxu2 %v160_v33 }
 0x22e   :  { %v1044_v35 = vpop.eup %770 }
 0x22f   :  { %v1046_v36 = vpop.eup %772  ;;  %v278_v37 = vsel %vm121_vm2, %v1044_v35, 0.0 }
 0x230   :  { %279 = vadd.xlane.f32.xlu2 %v278_v37  ;;  %v211_v38 = vsel %vm121_vm2, %v1046_v36, 0.0 }
 0x231   :  { %232 = vmatpush.bf16.msrb.mxu2 %v223_v34  ;;  %212 = vadd.xlane.f32.xlu1 %v211_v38 }
 0x233   :  { %351 = vrot.lane.b32.xlu0 %v976_v19, %s918_s19  ;;  %v406_v39 = vpop.xlane.xlu1 %405 }
 0x234   :  { %v407_v41 = vsub.f32 %v400_v0, %v406_v39 }
 0x236   :  { %v408_v42 = vmul.f32 1.442695, %v407_v41 }
 0x238   :  { %774 = vpow2.f32 %v408_v42 }
 0x23b   :  { %v341_v40 = vpop.xlane.xlu1 %340 }
 0x23c   :  { %v342_v45 = vsub.f32 %v1020_v1, %v341_v40 }
 0x23e   :  { %v343_v47 = vmul.f32 1.442695, %v342_v45  ;;  %v775_v48 = vpop.eup %774 }
 0x240   :  { %776 = vpow2.f32 %v343_v47 }
 0x243   :  { %v534_v43 = vpop.xlane.xlu0 %533 }
 0x246   :  { %v777_v51 = vpop.eup %776 }
 0x247   :  { %v345_v55 = vsel %vm121_vm2, %v777_v51, 0.0 }
 0x248   :  { %478 = vrot.lane.b32.xlu2 %v981_v25, %s916_s17  ;;  %v410_v25 = vsel %vm121_vm2, %v775_v48, 0.0 }
 0x24a   :  { %416 = vrot.lane.b32.xlu1 %v986_v28, %s903_s26  ;;  %v535_v28 = vsub.f32 %v1027_v6, %v534_v43 }
 0x24c   :  { %v536_v52 = vmul.f32 1.442695, %v535_v28 }
 0x251   :  { %v600_v19 = vpop.xlane.xlu0 %599 }
 0x252   :  { %v601_v49 = vsub.f32 %v594_v11, %v600_v19 }
 0x253   :  { %v285_v44 = vpop.permute.xlu1 %284 }
 0x254   :  { %v290_v46 = vsel %vm158_vm3, %v285_v44, 0  ;;  %v602_v50 = vmul.f32 1.442695, %v601_v49 }
 0x255   :  { %299 = vmatpush.bf16.msrb.mxu1 %v290_v46 }
 0x256   :  { %778 = vpow2.f32 %v602_v50 }
 0x257   :  { %780 = vpow2.f32 %v536_v52 }
 0x25c   :  { %v1064_v57 = vpop.eup %778 }
 0x25d   :  { %411 = vadd.xlane.f32.xlu0 %v410_v25  ;;  %v1066_v58 = vpop.eup %780  ;;  %v604_v59 = vsel %vm121_vm2, %v1064_v57, 0.0 }
 0x25e   :  { %v538_v61 = vsel %vm121_vm2, %v1066_v58, 0.0 }
 0x264   :  { %v468_v53 = vpop.xlane.xlu2 %467 }
 0x265   :  { %v469_v54 = vsub.f32 %v1029_v7, %v468_v53  ;;  %346 = vadd.xlane.f32.xlu0 %v345_v55 }
 0x267   :  { %v470_v56 = vmul.f32 1.442695, %v469_v54 }
 0x269   :  { %782 = vpow2.f32 %v470_v56 }
 0x26d   :  { %605 = vadd.xlane.f32.xlu0 %v604_v59 }
 0x26f   :  { %v783_v60 = vpop.eup %782 }
 0x270   :  { %v472_v62 = vsel %vm121_vm2, %v783_v60, 0.0 }
 0x271   :  { %539 = vadd.xlane.f32.xlu2 %v538_v61 }
 0x274   :  { %473 = vadd.xlane.f32.xlu1 %v472_v62 }
 0x281   :  { %610 = vrot.lane.b32.xlu0 %v992_v31, %s918_s19 }
 0x28d   :  { %544 = vrot.lane.b32.xlu1 %v994_v32, %s917_s18 }
 0x292   :  { %v149_v63 = vpop.xlane.xlu0 %148 }
 0x293   :  { %784 = vrcp.f32 %v149_v63 }
 0x299   :  { %v785_v0 = vpop.eup %784 }
 0x29a   :  { %v151_v1 = vmul.f32 %v785_v0, %v1038_v18 }
 0x29c   :  { %v152_v2 = vpack.c.bf16 %v151_v1, %v151_v1 }
 0x29e   :  { %713 = vmatmul.msk.bf16.vlgmr.msra.gmra.mxu2 %vm121_vm2, %v152_v2 }
 0x2a3   :  { %v280_v3 = vpop.xlane.xlu2 %279 }
 0x2a4   :  { %786 = vrcp.f32 %v280_v3  ;;  %v213_v4 = vpop.xlane.xlu1 %212 }
 0x2a5   :  { %788 = vrcp.f32 %v213_v4  ;;  %v352_v5 = vpop.permute.xlu0 %351  ;;  %v745_v4 = vld [vmem:[#allocation9 + $0x8] sm:$0xff] }
 0x2a6   :  { %v357_v6 = vsel %vm158_vm3, %v352_v5, 0  ;;  %673 = vmatpush.bf16.msra.mxu0 %v745_v4  ;;  %v744_v5 = vld [vmem:[#allocation9] sm:$0xff] }
 0x2a7   :  { %366 = vmatpush.bf16.msra.mxu2 %v357_v6 }
 0x2aa   :  { %v787_v31 = vpop.eup %786  ;;  %674 = vmatpush.bf16.msra.mxu0 %v744_v5 }
 0x2ab   :  { %v789_v7 = vpop.eup %788  ;;  %v282_v32 = vmul.f32 %v787_v31, %v1044_v35  ;;  %v479_v9 = vpop.permute.xlu2 %478 }
 0x2ac   :  { %v215_v8 = vmul.f32 %v789_v7, %v1046_v36  ;;  %v484_v12 = vsel %vm158_vm3, %v479_v9, 0 }
 0x2ad   :  { %v283_v10 = vpack.c.bf16 %v282_v32, %v282_v32 }
 0x2ae   :  { %v216_v11 = vpack.c.bf16 %v215_v8, %v215_v8  ;;  %v767_v8 = vld [vmem:[%s1113_s4] ss:$0 sm:$0xff] }
 0x2af   :  { %717 = vmatmul.msk.bf16.vlgmr.msrb.gmra.mxu1 %vm121_vm2, %v283_v10 }
 0x2b0   :  { %715 = vmatmul.msk.bf16.vlgmr.msrb.gmra.mxu2 %vm121_vm2, %v216_v11 }
 0x2b1   :  { %493 = vmatpush.bf16.msrb.mxu2 %v484_v12 }
 0x2bc   :  { %v417_v13 = vpop.permute.xlu1 %416 }
 0x2bd   :  { %v422_v14 = vsel %vm158_vm3, %v417_v13, 0 }
 0x2be   :  { %431 = vmatpush.bf16.msra.mxu1 %v422_v14 }
 0x2d0   :  { %v412_v15 = vpop.xlane.xlu0 %411 }
 0x2d1   :  { %790 = vrcp.f32 %v412_v15 }
 0x2d7   :  { %v791_v16 = vpop.eup %790 }
 0x2d8   :  { %v414_v17 = vmul.f32 %v791_v16, %v775_v48  ;;  %v347_v18 = vpop.xlane.xlu0 %346 }
 0x2d9   :  { %792 = vrcp.f32 %v347_v18 }
 0x2da   :  { %v415_v20 = vpack.c.bf16 %v414_v17, %v414_v17 }
 0x2dc   :  { %721 = vmatmul.msk.bf16.vlgmr.msra.gmra.mxu1 %vm121_vm2, %v415_v20 }
 0x2df   :  { %v793_v21 = vpop.eup %792 }
 0x2e0   :  { %v349_v22 = vmul.f32 %v793_v21, %v777_v51  ;;  %v606_v24 = vpop.xlane.xlu0 %605 }
 0x2e2   :  { %v350_v23 = vpack.c.bf16 %v349_v22, %v349_v22 }
 0x2e4   :  { %719 = vmatmul.msk.bf16.vlgmr.msra.gmra.mxu2 %vm121_vm2, %v350_v23  ;;  %v540_v30 = vpop.xlane.xlu2 %539 }
 0x2e7   :  { %v474_v26 = vpop.xlane.xlu1 %473 }
 0x2e8   :  { %794 = vrcp.f32 %v474_v26 }
 0x2e9   :  { %796 = vrcp.f32 %v540_v30 }
 0x2ea   :  { %798 = vrcp.f32 %v606_v24 }
 0x2ee   :  { %v795_v27 = vpop.eup %794 }
 0x2ef   :  { %v476_v29 = vmul.f32 %v795_v27, %v783_v60  ;;  %v797_v36 = vpop.eup %796 }
 0x2f0   :  { %v799_v37 = vpop.eup %798  ;;  %v542_v38 = vmul.f32 %v797_v36, %v1066_v58 }
 0x2f1   :  { %v477_v33 = vpack.c.bf16 %v476_v29, %v476_v29  ;;  %v608_v39 = vmul.f32 %v799_v37, %v1064_v57 }
 0x2f2   :  { %v543_v42 = vpack.c.bf16 %v542_v38, %v542_v38 }
 0x2f3   :  { %v611_v34 = vpop.permute.xlu0 %610  ;;  %v609_v43 = vpack.c.bf16 %v608_v39, %v608_v39 }
 0x2f4   :  { %v616_v35 = vsel %vm158_vm3, %v611_v34, 0  ;;  %723 = vmatmul.msk.bf16.vlgmr.msrb.gmra.mxu2 %vm121_vm2, %v477_v33 }
 0x2f5   :  { %625 = vmatpush.bf16.msra.mxu2 %v616_v35 }
 0x2ff   :  { %v545_v40 = vpop.permute.xlu1 %544 }
 0x300   :  { %v550_v41 = vsel %vm158_vm3, %v545_v40, 0 }
 0x301   :  { %559 = vmatpush.bf16.msrb.mxu1 %v550_v41 }
 0x304   :  { %725 = vmatmul.msk.bf16.vlgmr.msrb.gmra.mxu1 %vm121_vm2, %v543_v42  ;;  %727 = vmatmul.msk.bf16.vlgmr.msra.gmra.mxu2 %vm121_vm2, %v609_v43 }
 0x321   :  { %v171_v44 = vpop.f32.mrf.mxu2 }
 0x322   :  { %v175_v45 = vpack.c.bf16 %v171_v44, %v171_v44 }
 0x324   :  { %177 = vst.msk [vmem:[#allocation3] sm:$0xf] %vm176_vm4, %v175_v45 }
 0x329   :  { %v173_v46 = vpop.f32.mrf.mxu2 }
 0x32c   :  { %v301_v47 = vpop.f32.mrf.mxu1 }
 0x32d   :  { %v305_v19 = vpack.c.bf16 %v301_v47, %v301_v47 }
 0x32f   :  { %307 = vrot.lane.b32.xlu0 %v305_v19, %s919_s20 }
 0x333   :  { %v234_v48 = vpop.f32.mrf.mxu2 }
 0x334   :  { %v303_v49 = vpop.f32.mrf.mxu1  ;;  %v238_v25 = vpack.c.bf16 %v234_v48, %v234_v48 }
 0x337   :  { %240 = vrot.lane.b32.xlu0 %v238_v25, %s907_s1 }
 0x33b   :  { %v236_v28 = vpop.f32.mrf.mxu2 }
 0x359   :  { %v433_v50 = vpop.f32.mrf.mxu1 }
 0x35a   :  { %v437_v51 = vpack.c.bf16 %v433_v50, %v433_v50 }
 0x35c   :  { %438 = vst.msk [vmem:[#allocation3 + $0x4] sm:$0xf] %vm176_vm4, %v437_v51 }
 0x361   :  { %v435_v52 = vpop.f32.mrf.mxu1 }
 0x367   :  { %v368_v53 = vpop.f32.mrf.mxu2 }
 0x368   :  { %v372_v54 = vpack.c.bf16 %v368_v53, %v368_v53 }
 0x36a   :  { %374 = vrot.lane.b32.xlu2 %v372_v54, %s920_s21 }
 0x36f   :  { %v370_v55 = vpop.f32.mrf.mxu2 }
 0x377   :  { %v495_v56 = vpop.f32.mrf.mxu2 }
 0x378   :  { %v499_v57 = vpack.c.bf16 %v495_v56, %v495_v56 }
 0x37a   :  { %501 = vrot.lane.b32.xlu1 %v499_v57, %s907_s1 }
 0x37f   :  { %v497_v58 = vpop.f32.mrf.mxu2 }
 0x381   :  { %v561_v59 = vpop.f32.mrf.mxu1 }
 0x382   :  { %v565_v60 = vpack.c.bf16 %v561_v59, %v561_v59 }
 0x384   :  { %567 = vrot.lane.b32.xlu1 %v565_v60, %s919_s20 }
 0x387   :  { %v627_v61 = vpop.f32.mrf.mxu2 }
 0x388   :  { %v631_v63 = vpack.c.bf16 %v627_v61, %v627_v61 }
 0x389   :  { %v563_v62 = vpop.f32.mrf.mxu1 }
 0x38a   :  { %633 = vrot.lane.b32.xlu0 %v631_v63, %s920_s21 }
 0x38f   :  { %v629_v0 = vpop.f32.mrf.mxu2 }
 0x3a1   :  { %v308_v1 = vpop.permute.xlu0 %307 }
 0x3a9   :  { %v241_v2 = vpop.permute.xlu0 %240 }
 0x3aa   :  { %244 = vst.msk [vmem:[#allocation3] sm:$0xf] %vm243_vm5, %v241_v2 }
 0x3ab   :  { %311 = vst.msk [vmem:[#allocation3] sm:$0xf] %vm310_vm6, %v308_v1 }
 0x3c4   :  { %v375_v3 = vpop.permute.xlu2 %374 }
 0x3c5   :  { %378 = vst.msk [vmem:[#allocation3] sm:$0xf] %vm377_vm7, %v375_v3 }
 0x3ec   :  { %v502_v6 = vpop.permute.xlu1 %501 }
 0x3ed   :  { %504 = vst.msk [vmem:[#allocation3 + $0x4] sm:$0xf] %vm243_vm5, %v502_v6 }
 0x3f6   :  { %v568_v31 = vpop.permute.xlu1 %567 }
 0x3f7   :  { %570 = vst.msk [vmem:[#allocation3 + $0x4] sm:$0xf] %vm310_vm6, %v568_v31 }
 0x3fc   :  { %v634_v7 = vpop.permute.xlu0 %633 }
 0x3fd   :  { %636 = vst.msk [vmem:[#allocation3 + $0x4] sm:$0xf] %vm377_vm7, %v634_v7 }
 0x404   :  { %v743_v32 = vld [vmem:[#allocation3] sm:$0xff] }
 0x405   :  { %740 = vmatmul.msk.bf16.vlgmr.msra.gmra.mxu0 %vm92_vm0, %v743_v32 }
 0x482   :  { %v676_v9 = vpop.f32.mrf.mxu0 }
 0x483   :  { %v677_v10 = vadd.f32 %v767_v8, %v676_v9 }
 0x485   :  { %681 = vst.msk [vmem:[#allocation10] sm:$0xff] %vm92_vm0, %v677_v10 }
 0x48a   :  { %v678_v11 = vpop.f32.mrf.mxu0 }
 0x48b   :  { %v679_v12 = vadd.f32 %v767_v8, %v678_v11 }
 0x48d   :  { %682 = vst.msk [vmem:[#allocation10 + $0x8] sm:$0xff] %vm92_vm0, %v679_v12 }
 0x48e   :  { %695 = dma.vmem_to_hbm [thread:$0]  %s688_s25, 256, %s690_s28, [#allocation6], %s906_s30, %s906_s30, %s907_s1  }
 0x48f   :  { %900 = dma.done.wait [#allocation6], 256  }
 0x490   :  { %901 = vsyncadd [#allocation6], 4294967040 }
 0x491   :  { %700 = vsyncpa [#allocation5], 1 }
 0x492   :  { %701 = vsyncpa [#allocation8], 1 }
 0x493   :  { %702 = vsyncpa [#allocation6], 1 }

// kernel: tpu_custom_call.1
= control target key start
LH: loop header
LB: loop body
LE: loop exit
PB: predicated region body
PF: predicated region fallthrough
CT: control target
= control target key end

     0   :  { %10 = vsyncpa [#allocation5], 0  ;;  %s1109_s0 = inlined_call_operand.hbm [shape: f32[2,8,32], index: 0, kind: input, shape index: {}]   ;;  %s1110_s1 = inlined_call_operand.hbm [shape: bf16[32,96], index: 1, kind: input, shape index: {}]   ;;  %s1111_s2 = inlined_call_operand.vmem [shape: f32[1,96], index: 2, kind: input, shape index: {}]   ;;  %s1112_s3 = inlined_call_operand.hbm [shape: bf16[32,32], index: 3, kind: input, shape index: {}]   ;;  %s1113_s4 = inlined_call_operand.vmem [shape: f32[1,32], index: 4, kind: input, shape index: {}]   ;;  %s1114_s5 = inlined_call_operand.hbm [shape: f32[2,8,32], index: 5, kind: output, shape index: {}]  }
   0x1   :  { %11 = vsyncpa [#allocation8], 0  ;;  %s30_s20 = sshll.u32 %s1110_s1, 4  ;;  %s31_s20 = int_to_ptr.hbm [resolvable:$true] %s30_s20 }
   0x2   :  { %12 = vsyncpa [#allocation6], 0  ;;  %s902_s21 = smov [#allocation7]   ;;  %s17_s25 = sshll.u32 %s1109_s0, 4  ;;  %s18_s25 = int_to_ptr.hbm [resolvable:$true] %s17_s25 }
   0x3   :  { %s32_s22 = sshll.u32 %s902_s21, 4  ;;  %s903_s26 = smov 64   ;;  %s33_s22 = int_to_ptr.vmem [resolvable:$true] %s32_s22 }
   0x4   :  { %s904_s27 = smov 4   ;;  %s905_s28 = smov [#allocation4]  }
   0x5   :  { %38 = dma.hbm_to_vmem [thread:$0]  %s31_s20, 256, %s33_s22, [#allocation8], %s903_s26, %s903_s26, %s904_s27  }
   0x6   :  { %s19_s29 = sshll.u32 %s905_s28, 4  ;;  %s906_s30 = smov 128   ;;  %s20_s29 = int_to_ptr.vmem [resolvable:$true] %s19_s29 }
   0x7   :  { %s907_s1 = smov 8   ;;  %s45_s8 = sshll.u32 %s1112_s3, 4  ;;  %s46_s8 = int_to_ptr.hbm [resolvable:$true] %s45_s8 }
   0x8   :  { %25 = dma.hbm_to_vmem [thread:$0]  %s18_s25, 256, %s20_s29, [#allocation5], %s906_s30, %s906_s30, %s907_s1  }
   0x9   :  { %s908_s0 = smov [#allocation9]  }
   0xa   :  { %s47_s9 = sshll.u32 %s908_s0, 4  ;;  %s48_s9 = int_to_ptr.vmem [resolvable:$true] %s47_s9 }
   0xb   :  { %53 = dma.hbm_to_vmem [thread:$0]  %s46_s8, 256, %s48_s9, [#allocation8], %s903_s26, %s903_s26, %s904_s27  }
   0xc   :  { %896 = dma.done.wait [#allocation5], 256  }
   0xd   :  { %897 = vsyncadd [#allocation5], 4294967040 }
   0xe   :  { %898 = dma.done.wait [#allocation8], 512  }
   0xf   :  { %899 = vsyncadd [#allocation8], 4294966784  ;;  %v742_v0 = vld [vmem:[#allocation7 + $0x8] sm:$0xff]  ;;  %v741_v1 = vld [vmem:[#allocation7] sm:$0xff]  ;;  %vm92_vm0 = vcmask 261120   ;;  %vm112_vm1 = vcmask 781312  }
  0x10   :  { %102 = vmatpush.bf16.msra.mxu0 %v742_v0  ;;  %v69_v2 = vld [vmem:[#allocation4] sm:$0xff]  ;;  %v70_v3 = vld [vmem:[#allocation4 + $0x8] sm:$0xff]  ;;  %v766_v5 = vld [vmem:[%s1111_s2] ss:$0 sm:$0xff]  ;;  %s909_s11 = smov 96   ;;  %s910_s2 = smov 104  }
  0x11   :  { %v71_v4 = vpack.c.bf16 %v70_v3, %v69_v2  ;;  %s911_s12 = smov 120   ;;  %s912_s13 = smov 88   ;;  %vm121_vm2 = vcmask 64512   ;;  %vm158_vm3 = vcmask 1043456   ;;  %vm176_vm4 = vcmask 60416  }
  0x12   :  { %s913_s14 = smov 80   ;;  %s914_s15 = smov 72   ;;  %vm243_vm5 = vcmask 126016   ;;  %vm310_vm6 = vcmask 191616   ;;  %vm377_vm7 = vcmask 257216  }
  0x13   :  { %s915_s16 = smov 112   ;;  %s916_s17 = smov 56  }
  0x14   :  { %103 = vmatpush.bf16.msra.mxu0 %v741_v1  ;;  %s917_s18 = smov 48   ;;  %s918_s19 = smov 40  }
  0x15   :  { %s919_s20 = smov 16   ;;  %s920_s21 = smov 24  }
  0x16   :  { %s921_s24 = smov [#allocation10]   ;;  %s689_s28 = sshll.u32 %s1114_s5, 4  ;;  %s690_s28 = int_to_ptr.hbm [resolvable:$true] %s689_s28 }
  0x17   :  { %711 = vmatmul.msk.bf16.vlgmr.msra.gmra.mxu0 %vm92_vm0, %v71_v4  ;;  %s687_s25 = sshll.u32 %s921_s24, 4  ;;  %s688_s25 = int_to_ptr.vmem [resolvable:$true] %s687_s25 }
  0x94   :  { %v105_v6 = vpop.f32.mrf.mxu0 }
  0x95   :  { %v106_v7 = vadd.f32 %v766_v5, %v105_v6 }
  0x97   :  { %v110_v8 = vpack.c.bf16 %v106_v7, %v106_v7 }
  0x99   :  { %113 = vst.msk [vmem:[#allocation2] sm:$0xf] %vm112_vm1, %v110_v8 }
  0x9c   :  { %v107_v9 = vpop.f32.mrf.mxu0 }
  0x9d   :  { %v108_v10 = vadd.f32 %v766_v5, %v107_v9 }
  0x9f   :  { %v111_v11 = vpack.c.bf16 %v108_v10, %v108_v10 }
  0xa0   :  { %v115_v12 = vld [vmem:[#allocation2] sm:$0xf] }
  0xa1   :  { %114 = vst.msk [vmem:[#allocation2 + $0x4] sm:$0xf] %vm112_vm1, %v111_v11  ;;  %v117_v13 = vunpack.c.l.b16 %v115_v12 }
  0xa3   :  { %v972_v14 = vpack.c.b16 %v117_v13, %v117_v13 }
  0xa5   :  { %119 = vrot.lane.b32.xlu0 %v972_v14, %s909_s11 }
  0xa8   :  { %v312_v15 = vld [vmem:[#allocation2] sm:$0xff]  }
  0xa9   :  { %v178_v16 = vld [vmem:[#allocation2] sm:$0xff]   ;;  %v314_v17 = vunpack.c.l.b16 %v312_v15  ;;  %v441_v23 = vunpack.c.h.b16 %v312_v15 }
  0xaa   :  { %v180_v18 = vunpack.c.l.b16 %v178_v16  ;;  %v245_v21 = vld [vmem:[#allocation2] sm:$0xff]   ;;  %v573_v29 = vunpack.c.h.b16 %v178_v16 }
  0xab   :  { %v976_v19 = vpack.c.b16 %v314_v17, %v314_v17  ;;  %v247_v22 = vunpack.c.l.b16 %v245_v21  ;;  %v981_v25 = vpack.c.b16 %v441_v23, %v441_v23  ;;  %v379_v26 = vld [vmem:[#allocation2 + $0x4] sm:$0xf]  ;;  %v507_v30 = vunpack.c.h.b16 %v245_v21 }
  0xac   :  { %v181_v20 = vpack.c.b16 %v180_v18, %v180_v18  ;;  %v381_v27 = vunpack.c.l.b16 %v379_v26  ;;  %v992_v31 = vpack.c.b16 %v573_v29, %v573_v29 }
  0xad   :  { %316 = vrot.lane.b32.xlu2 %v976_v19, %s910_s2  ;;  %v979_v24 = vpack.c.b16 %v247_v22, %v247_v22  ;;  %v994_v32 = vpack.c.b16 %v507_v30, %v507_v30 }
  0xae   :  { %182 = vrot.lane.b32.xlu1 %v181_v20, %s911_s12  ;;  %184 = vrot.lane.b32.xlu0 %v181_v20, %s912_s13  ;;  %v986_v28 = vpack.c.b16 %v381_v27, %v381_v27 }
  0xb5   :  { %251 = vrot.lane.b32.xlu2 %v979_v24, %s913_s14 }
  0xb6   :  { %318 = vrot.lane.b32.xlu1 %v976_v19, %s914_s15  ;;  %445 = vrot.lane.b32.xlu0 %v981_v25, %s912_s13 }
  0xbd   :  { %443 = vrot.lane.b32.xlu2 %v981_v25, %s911_s12 }
  0xbe   :  { %249 = vrot.lane.b32.xlu1 %v979_v24, %s915_s16  ;;  %383 = vrot.lane.b32.xlu0 %v986_v28, %s909_s11 }
  0xc5   :  { %575 = vrot.lane.b32.xlu2 %v992_v31, %s910_s2 }
  0xc6   :  { %577 = vrot.lane.b32.xlu1 %v992_v31, %s914_s15  ;;  %511 = vrot.lane.b32.xlu0 %v994_v32, %s913_s14 }
  0xce   :  { %509 = vrot.lane.b32.xlu1 %v994_v32, %s915_s16 }
  0xd6   :  { %217 = vrot.lane.b32.xlu1 %v181_v20, %s916_s17 }
 0x107   :  { %v317_v33 = vpop.permute.xlu2 %316 }
 0x10f   :  { %v252_v34 = vpop.permute.xlu2 %251 }
 0x110   :  { %v257_v35 = vsel %vm121_vm2, %v252_v34, 0 }
 0x111   :  { %266 = vmatpush.bf16.xpose.msrb.mxu0 %v257_v35 }
 0x117   :  { %v120_v36 = vpop.permute.xlu0 %119  ;;  %v444_v52 = vpop.permute.xlu2 %443 }
 0x118   :  { %v126_v37 = vsel %vm121_vm2, %v120_v36, 0 }
 0x119   :  { %135 = vmatpush.bf16.xpose.msra.mxu1 %v126_v37 }
 0x11f   :  { %v576_v54 = vpop.permute.xlu2 %575 }
 0x120   :  { %v183_v38 = vpop.permute.xlu1 %182  ;;  %v185_v39 = vpop.permute.xlu0 %184  ;;  %712 = vmatmul.msk.bf16.vlgmr.msra.gmra.mxu1 %vm121_vm2, %v115_v12 }
 0x121   :  { %v190_v40 = vsel %vm121_vm2, %v185_v39, 0 }
 0x122   :  { %199 = vmatpush.bf16.xpose.msra.mxu3 %v190_v40 }
 0x128   :  { %v319_v41 = vpop.permute.xlu1 %318  ;;  %v446_v43 = vpop.permute.xlu0 %445 }
 0x129   :  { %v324_v42 = vsel %vm121_vm2, %v319_v41, 0  ;;  %v451_v44 = vsel %vm121_vm2, %v446_v43, 0  ;;  %714 = vmatmul.msk.bf16.vlgmr.msra.gmra.mxu3 %vm121_vm2, %v183_v38 }
 0x12a   :  { %333 = vmatpush.bf16.xpose.msrb.mxu3 %v324_v42 }
 0x130   :  { %v250_v45 = vpop.permute.xlu1 %249  ;;  %v384_v46 = vpop.permute.xlu0 %383 }
 0x131   :  { %716 = vmatmul.msk.bf16.vlgmr.msrb.gmra.mxu0 %vm121_vm2, %v250_v45  ;;  %v389_v47 = vsel %vm121_vm2, %v384_v46, 0 }
 0x132   :  { %460 = vmatpush.bf16.xpose.msra.mxu3 %v451_v44  ;;  %398 = vmatpush.bf16.xpose.msra.mxu0 %v389_v47 }
 0x138   :  { %v578_v48 = vpop.permute.xlu1 %577  ;;  %v512_v50 = vpop.permute.xlu0 %511 }
 0x139   :  { %v583_v49 = vsel %vm121_vm2, %v578_v48, 0  ;;  %v517_v51 = vsel %vm121_vm2, %v512_v50, 0  ;;  %718 = vmatmul.msk.bf16.vlgmr.msrb.gmra.mxu3 %vm121_vm2, %v317_v33 }
 0x13a   :  { %526 = vmatpush.bf16.xpose.msrb.mxu0 %v517_v51  ;;  %592 = vmatpush.bf16.xpose.msrb.mxu3 %v583_v49 }
 0x140   :  { %v510_v53 = vpop.permute.xlu1 %509 }
 0x141   :  { %720 = vmatmul.msk.bf16.vlgmr.msra.gmra.mxu0 %vm121_vm2, %v379_v26 }
 0x148   :  { %v218_v29 = vpop.permute.xlu1 %217 }
 0x149   :  { %722 = vmatmul.msk.bf16.vlgmr.msra.gmra.mxu3 %vm121_vm2, %v444_v52  ;;  %v223_v34 = vsel %vm158_vm3, %v218_v29, 0 }
 0x151   :  { %724 = vmatmul.msk.bf16.vlgmr.msrb.gmra.mxu0 %vm121_vm2, %v510_v53 }
 0x159   :  { %726 = vmatmul.msk.bf16.vlgmr.msrb.gmra.mxu3 %vm121_vm2, %v576_v54 }
 0x19d   :  { %v137_v55 = vpop.f32.mrf.mxu1 }
 0x19e   :  { %v141_v56 = vsel %vm121_vm2, %v137_v55, -inf }
 0x19f   :  { %142 = vmax.xlane.f32.xlu2 %v141_v56 }
 0x1a5   :  { %v139_v57 = vpop.f32.mrf.mxu1 }
 0x1ac   :  { %v201_v59 = vpop.f32.mrf.mxu3 }
 0x1ad   :  { %v205_v61 = vsel %vm121_vm2, %v201_v59, -inf }
 0x1ae   :  { %v268_v58 = vpop.f32.mrf.mxu0  ;;  %206 = vmax.xlane.f32.xlu0 %v205_v61 }
 0x1af   :  { %v272_v60 = vsel %vm121_vm2, %v268_v58, -inf }
 0x1b0   :  { %273 = vmax.xlane.f32.xlu2 %v272_v60 }
 0x1b4   :  { %v203_v63 = vpop.f32.mrf.mxu3 }
 0x1b6   :  { %v270_v62 = vpop.f32.mrf.mxu0 }
 0x1bc   :  { %v1020_v1 = vpop.f32.mrf.mxu3 }
 0x1bd   :  { %v339_v5 = vsel %vm121_vm2, %v1020_v1, -inf }
 0x1be   :  { %v400_v0 = vpop.f32.mrf.mxu0 }
 0x1bf   :  { %v404_v2 = vsel %vm121_vm2, %v400_v0, -inf }
 0x1c0   :  { %405 = vmax.xlane.f32.xlu1 %v404_v2 }
 0x1c4   :  { %v337_v4 = vpop.f32.mrf.mxu3 }
 0x1c6   :  { %v402_v3 = vpop.f32.mrf.mxu0 }
 0x1c8   :  { %153 = vrot.lane.b32.xlu2 %v972_v14, %s903_s26  ;;  %340 = vmax.xlane.f32.xlu1 %v339_v5 }
 0x1cc   :  { %v1029_v7 = vpop.f32.mrf.mxu3 }
 0x1cd   :  { %v466_v14 = vsel %vm121_vm2, %v1029_v7, -inf }
 0x1ce   :  { %v1027_v6 = vpop.f32.mrf.mxu0 }
 0x1cf   :  { %v532_v8 = vsel %vm121_vm2, %v1027_v6, -inf }
 0x1d0   :  { %533 = vmax.xlane.f32.xlu0 %v532_v8 }
 0x1d4   :  { %v464_v10 = vpop.f32.mrf.mxu3 }
 0x1d6   :  { %v530_v9 = vpop.f32.mrf.mxu0 }
 0x1dc   :  { %v594_v11 = vpop.f32.mrf.mxu3 }
 0x1dd   :  { %v598_v12 = vsel %vm121_vm2, %v594_v11, -inf }
 0x1de   :  { %599 = vmax.xlane.f32.xlu0 %v598_v12 }
 0x1e1   :  { %284 = vrot.lane.b32.xlu1 %v979_v24, %s917_s18 }
 0x1e4   :  { %v596_v13 = vpop.f32.mrf.mxu3 }
 0x1f1   :  { %467 = vmax.xlane.f32.xlu2 %v466_v14 }
 0x212   :  { %v143_v15 = vpop.xlane.xlu2 %142 }
 0x213   :  { %v144_v16 = vsub.f32 %v137_v55, %v143_v15 }
 0x215   :  { %v145_v17 = vmul.f32 1.442695, %v144_v16 }
 0x217   :  { %768 = vpow2.f32 %v145_v17 }
 0x21d   :  { %v1038_v18 = vpop.eup %768 }
 0x21e   :  { %v147_v20 = vsel %vm121_vm2, %v1038_v18, 0.0 }
 0x21f   :  { %148 = vadd.xlane.f32.xlu0 %v147_v20 }
 0x221   :  { %v207_v22 = vpop.xlane.xlu0 %206 }
 0x222   :  { %v208_v26 = vsub.f32 %v201_v59, %v207_v22 }
 0x223   :  { %v274_v21 = vpop.xlane.xlu2 %273 }
 0x224   :  { %v275_v23 = vsub.f32 %v268_v58, %v274_v21  ;;  %v209_v27 = vmul.f32 1.442695, %v208_v26 }
 0x226   :  { %v276_v24 = vmul.f32 1.442695, %v275_v23 }
 0x228   :  { %770 = vpow2.f32 %v276_v24 }
 0x229   :  { %772 = vpow2.f32 %v209_v27 }
 0x22b   :  { %v154_v30 = vpop.permute.xlu2 %153 }
 0x22c   :  { %v160_v33 = vsel %vm158_vm3, %v154_v30, 0 }
 0x22d   :  { %169 = vmatpush.bf16.msra.mxu2 %v160_v33 }
 0x22e   :  { %v1044_v35 = vpop.eup %770 }
 0x22f   :  { %v1046_v36 = vpop.eup %772  ;;  %v278_v37 = vsel %vm121_vm2, %v1044_v35, 0.0 }
 0x230   :  { %279 = vadd.xlane.f32.xlu2 %v278_v37  ;;  %v211_v38 = vsel %vm121_vm2, %v1046_v36, 0.0 }
 0x231   :  { %232 = vmatpush.bf16.msrb.mxu2 %v223_v34  ;;  %212 = vadd.xlane.f32.xlu1 %v211_v38 }
 0x233   :  { %351 = vrot.lane.b32.xlu0 %v976_v19, %s918_s19  ;;  %v406_v39 = vpop.xlane.xlu1 %405 }
 0x234   :  { %v407_v41 = vsub.f32 %v400_v0, %v406_v39 }
 0x236   :  { %v408_v42 = vmul.f32 1.442695, %v407_v41 }
 0x238   :  { %774 = vpow2.f32 %v408_v42 }
 0x23b   :  { %v341_v40 = vpop.xlane.xlu1 %340 }
 0x23c   :  { %v342_v45 = vsub.f32 %v1020_v1, %v341_v40 }
 0x23e   :  { %v343_v47 = vmul.f32 1.442695, %v342_v45  ;;  %v775_v48 = vpop.eup %774 }
 0x240   :  { %776 = vpow2.f32 %v343_v47 }
 0x243   :  { %v534_v43 = vpop.xlane.xlu0 %533 }
 0x246   :  { %v777_v51 = vpop.eup %776 }
 0x247   :  { %v345_v55 = vsel %vm121_vm2, %v777_v51, 0.0 }
 0x248   :  { %478 = vrot.lane.b32.xlu2 %v981_v25, %s916_s17  ;;  %v410_v25 = vsel %vm121_vm2, %v775_v48, 0.0 }
 0x24a   :  { %416 = vrot.lane.b32.xlu1 %v986_v28, %s903_s26  ;;  %v535_v28 = vsub.f32 %v1027_v6, %v534_v43 }
 0x24c   :  { %v536_v52 = vmul.f32 1.442695, %v535_v28 }
 0x251   :  { %v600_v19 = vpop.xlane.xlu0 %599 }
 0x252   :  { %v601_v49 = vsub.f32 %v594_v11, %v600_v19 }
 0x253   :  { %v285_v44 = vpop.permute.xlu1 %284 }
 0x254   :  { %v290_v46 = vsel %vm158_vm3, %v285_v44, 0  ;;  %v602_v50 = vmul.f32 1.442695, %v601_v49 }
 0x255   :  { %299 = vmatpush.bf16.msrb.mxu1 %v290_v46 }
 0x256   :  { %778 = vpow2.f32 %v602_v50 }
 0x257   :  { %780 = vpow2.f32 %v536_v52 }
 0x25c   :  { %v1064_v57 = vpop.eup %778 }
 0x25d   :  { %411 = vadd.xlane.f32.xlu0 %v410_v25  ;;  %v1066_v58 = vpop.eup %780  ;;  %v604_v59 = vsel %vm121_vm2, %v1064_v57, 0.0 }
 0x25e   :  { %v538_v61 = vsel %vm121_vm2, %v1066_v58, 0.0 }
 0x264   :  { %v468_v53 = vpop.xlane.xlu2 %467 }
 0x265   :  { %v469_v54 = vsub.f32 %v1029_v7, %v468_v53  ;;  %346 = vadd.xlane.f32.xlu0 %v345_v55 }
 0x267   :  { %v470_v56 = vmul.f32 1.442695, %v469_v54 }
 0x269   :  { %782 = vpow2.f32 %v470_v56 }
 0x26d   :  { %605 = vadd.xlane.f32.xlu0 %v604_v59 }
 0x26f   :  { %v783_v60 = vpop.eup %782 }
 0x270   :  { %v472_v62 = vsel %vm121_vm2, %v783_v60, 0.0 }
 0x271   :  { %539 = vadd.xlane.f32.xlu2 %v538_v61 }
 0x274   :  { %473 = vadd.xlane.f32.xlu1 %v472_v62 }
 0x281   :  { %610 = vrot.lane.b32.xlu0 %v992_v31, %s918_s19 }
 0x28d   :  { %544 = vrot.lane.b32.xlu1 %v994_v32, %s917_s18 }
 0x292   :  { %v149_v63 = vpop.xlane.xlu0 %148 }
 0x293   :  { %784 = vrcp.f32 %v149_v63 }
 0x299   :  { %v785_v0 = vpop.eup %784 }
 0x29a   :  { %v151_v1 = vmul.f32 %v785_v0, %v1038_v18 }
 0x29c   :  { %v152_v2 = vpack.c.bf16 %v151_v1, %v151_v1 }
 0x29e   :  { %713 = vmatmul.msk.bf16.vlgmr.msra.gmra.mxu2 %vm121_vm2, %v152_v2 }
 0x2a3   :  { %v280_v3 = vpop.xlane.xlu2 %279 }
 0x2a4   :  { %786 = vrcp.f32 %v280_v3  ;;  %v213_v4 = vpop.xlane.xlu1 %212 }
 0x2a5   :  { %788 = vrcp.f32 %v213_v4  ;;  %v352_v5 = vpop.permute.xlu0 %351  ;;  %v745_v4 = vld [vmem:[#allocation9 + $0x8] sm:$0xff] }
 0x2a6   :  { %v357_v6 = vsel %vm158_vm3, %v352_v5, 0  ;;  %673 = vmatpush.bf16.msra.mxu0 %v745_v4  ;;  %v744_v5 = vld [vmem:[#allocation9] sm:$0xff] }
 0x2a7   :  { %366 = vmatpush.bf16.msra.mxu2 %v357_v6 }
 0x2aa   :  { %v787_v31 = vpop.eup %786  ;;  %674 = vmatpush.bf16.msra.mxu0 %v744_v5 }
 0x2ab   :  { %v789_v7 = vpop.eup %788  ;;  %v282_v32 = vmul.f32 %v787_v31, %v1044_v35  ;;  %v479_v9 = vpop.permute.xlu2 %478 }
 0x2ac   :  { %v215_v8 = vmul.f32 %v789_v7, %v1046_v36  ;;  %v484_v12 = vsel %vm158_vm3, %v479_v9, 0 }
 0x2ad   :  { %v283_v10 = vpack.c.bf16 %v282_v32, %v282_v32 }
 0x2ae   :  { %v216_v11 = vpack.c.bf16 %v215_v8, %v215_v8  ;;  %v767_v8 = vld [vmem:[%s1113_s4] ss:$0 sm:$0xff] }
 0x2af   :  { %717 = vmatmul.msk.bf16.vlgmr.msrb.gmra.mxu1 %vm121_vm2, %v283_v10 }
 0x2b0   :  { %715 = vmatmul.msk.bf16.vlgmr.msrb.gmra.mxu2 %vm121_vm2, %v216_v11 }
 0x2b1   :  { %493 = vmatpush.bf16.msrb.mxu2 %v484_v12 }
 0x2bc   :  { %v417_v13 = vpop.permute.xlu1 %416 }
 0x2bd   :  { %v422_v14 = vsel %vm158_vm3, %v417_v13, 0 }
 0x2be   :  { %431 = vmatpush.bf16.msra.mxu1 %v422_v14 }
 0x2d0   :  { %v412_v15 = vpop.xlane.xlu0 %411 }
 0x2d1   :  { %790 = vrcp.f32 %v412_v15 }
 0x2d7   :  { %v791_v16 = vpop.eup %790 }
 0x2d8   :  { %v414_v17 = vmul.f32 %v791_v16, %v775_v48  ;;  %v347_v18 = vpop.xlane.xlu0 %346 }
 0x2d9   :  { %792 = vrcp.f32 %v347_v18 }
 0x2da   :  { %v415_v20 = vpack.c.bf16 %v414_v17, %v414_v17 }
 0x2dc   :  { %721 = vmatmul.msk.bf16.vlgmr.msra.gmra.mxu1 %vm121_vm2, %v415_v20 }
 0x2df   :  { %v793_v21 = vpop.eup %792 }
 0x2e0   :  { %v349_v22 = vmul.f32 %v793_v21, %v777_v51  ;;  %v606_v24 = vpop.xlane.xlu0 %605 }
 0x2e2   :  { %v350_v23 = vpack.c.bf16 %v349_v22, %v349_v22 }
 0x2e4   :  { %719 = vmatmul.msk.bf16.vlgmr.msra.gmra.mxu2 %vm121_vm2, %v350_v23  ;;  %v540_v30 = vpop.xlane.xlu2 %539 }
 0x2e7   :  { %v474_v26 = vpop.xlane.xlu1 %473 }
 0x2e8   :  { %794 = vrcp.f32 %v474_v26 }
 0x2e9   :  { %796 = vrcp.f32 %v540_v30 }
 0x2ea   :  { %798 = vrcp.f32 %v606_v24 }
 0x2ee   :  { %v795_v27 = vpop.eup %794 }
 0x2ef   :  { %v476_v29 = vmul.f32 %v795_v27, %v783_v60  ;;  %v797_v36 = vpop.eup %796 }
 0x2f0   :  { %v799_v37 = vpop.eup %798  ;;  %v542_v38 = vmul.f32 %v797_v36, %v1066_v58 }
 0x2f1   :  { %v477_v33 = vpack.c.bf16 %v476_v29, %v476_v29  ;;  %v608_v39 = vmul.f32 %v799_v37, %v1064_v57 }
 0x2f2   :  { %v543_v42 = vpack.c.bf16 %v542_v38, %v542_v38 }
 0x2f3   :  { %v611_v34 = vpop.permute.xlu0 %610  ;;  %v609_v43 = vpack.c.bf16 %v608_v39, %v608_v39 }
 0x2f4   :  { %v616_v35 = vsel %vm158_vm3, %v611_v34, 0  ;;  %723 = vmatmul.msk.bf16.vlgmr.msrb.gmra.mxu2 %vm121_vm2, %v477_v33 }
 0x2f5   :  { %625 = vmatpush.bf16.msra.mxu2 %v616_v35 }
 0x2ff   :  { %v545_v40 = vpop.permute.xlu1 %544 }
 0x300   :  { %v550_v41 = vsel %vm158_vm3, %v545_v40, 0 }
 0x301   :  { %559 = vmatpush.bf16.msrb.mxu1 %v550_v41 }
 0x304   :  { %725 = vmatmul.msk.bf16.vlgmr.msrb.gmra.mxu1 %vm121_vm2, %v543_v42  ;;  %727 = vmatmul.msk.bf16.vlgmr.msra.gmra.mxu2 %vm121_vm2, %v609_v43 }
 0x321   :  { %v171_v44 = vpop.f32.mrf.mxu2 }
 0x322   :  { %v175_v45 = vpack.c.bf16 %v171_v44, %v171_v44 }
 0x324   :  { %177 = vst.msk [vmem:[#allocation3] sm:$0xf] %vm176_vm4, %v175_v45 }
 0x329   :  { %v173_v46 = vpop.f32.mrf.mxu2 }
 0x32c   :  { %v301_v47 = vpop.f32.mrf.mxu1 }
 0x32d   :  { %v305_v19 = vpack.c.bf16 %v301_v47, %v301_v47 }
 0x32f   :  { %307 = vrot.lane.b32.xlu0 %v305_v19, %s919_s20 }
 0x333   :  { %v234_v48 = vpop.f32.mrf.mxu2 }
 0x334   :  { %v303_v49 = vpop.f32.mrf.mxu1  ;;  %v238_v25 = vpack.c.bf16 %v234_v48, %v234_v48 }
 0x337   :  { %240 = vrot.lane.b32.xlu0 %v238_v25, %s907_s1 }
 0x33b   :  { %v236_v28 = vpop.f32.mrf.mxu2 }
 0x359   :  { %v433_v50 = vpop.f32.mrf.mxu1 }
 0x35a   :  { %v437_v51 = vpack.c.bf16 %v433_v50, %v433_v50 }
 0x35c   :  { %438 = vst.msk [vmem:[#allocation3 + $0x4] sm:$0xf] %vm176_vm4, %v437_v51 }
 0x361   :  { %v435_v52 = vpop.f32.mrf.mxu1 }
 0x367   :  { %v368_v53 = vpop.f32.mrf.mxu2 }
 0x368   :  { %v372_v54 = vpack.c.bf16 %v368_v53, %v368_v53 }
 0x36a   :  { %374 = vrot.lane.b32.xlu2 %v372_v54, %s920_s21 }
 0x36f   :  { %v370_v55 = vpop.f32.mrf.mxu2 }
 0x377   :  { %v495_v56 = vpop.f32.mrf.mxu2 }
 0x378   :  { %v499_v57 = vpack.c.bf16 %v495_v56, %v495_v56 }
 0x37a   :  { %501 = vrot.lane.b32.xlu1 %v499_v57, %s907_s1 }
 0x37f   :  { %v497_v58 = vpop.f32.mrf.mxu2 }
 0x381   :  { %v561_v59 = vpop.f32.mrf.mxu1 }
 0x382   :  { %v565_v60 = vpack.c.bf16 %v561_v59, %v561_v59 }
 0x384   :  { %567 = vrot.lane.b32.xlu1 %v565_v60, %s919_s20 }
 0x387   :  { %v627_v61 = vpop.f32.mrf.mxu2 }
 0x388   :  { %v631_v63 = vpack.c.bf16 %v627_v61, %v627_v61 }
 0x389   :  { %v563_v62 = vpop.f32.mrf.mxu1 }
 0x38a   :  { %633 = vrot.lane.b32.xlu0 %v631_v63, %s920_s21 }
 0x38f   :  { %v629_v0 = vpop.f32.mrf.mxu2 }
 0x3a1   :  { %v308_v1 = vpop.permute.xlu0 %307 }
 0x3a9   :  { %v241_v2 = vpop.permute.xlu0 %240 }
 0x3aa   :  { %244 = vst.msk [vmem:[#allocation3] sm:$0xf] %vm243_vm5, %v241_v2 }
 0x3ab   :  { %311 = vst.msk [vmem:[#allocation3] sm:$0xf] %vm310_vm6, %v308_v1 }
 0x3c4   :  { %v375_v3 = vpop.permute.xlu2 %374 }
 0x3c5   :  { %378 = vst.msk [vmem:[#allocation3] sm:$0xf] %vm377_vm7, %v375_v3 }
 0x3ec   :  { %v502_v6 = vpop.permute.xlu1 %501 }
 0x3ed   :  { %504 = vst.msk [vmem:[#allocation3 + $0x4] sm:$0xf] %vm243_vm5, %v502_v6 }
 0x3f6   :  { %v568_v31 = vpop.permute.xlu1 %567 }
 0x3f7   :  { %570 = vst.msk [vmem:[#allocation3 + $0x4] sm:$0xf] %vm310_vm6, %v568_v31 }
 0x3fc   :  { %v634_v7 = vpop.permute.xlu0 %633 }
 0x3fd   :  { %636 = vst.msk [vmem:[#allocation3 + $0x4] sm:$0xf] %vm377_vm7, %v634_v7 }
 0x404   :  { %v743_v32 = vld [vmem:[#allocation3] sm:$0xff] }
 0x405   :  { %740 = vmatmul.msk.bf16.vlgmr.msra.gmra.mxu0 %vm92_vm0, %v743_v32 }
 0x482   :  { %v676_v9 = vpop.f32.mrf.mxu0 }
 0x483   :  { %v677_v10 = vadd.f32 %v767_v8, %v676_v9 }
 0x485   :  { %681 = vst.msk [vmem:[#allocation10] sm:$0xff] %vm92_vm0, %v677_v10 }
 0x48a   :  { %v678_v11 = vpop.f32.mrf.mxu0 }
 0x48b   :  { %v679_v12 = vadd.f32 %v767_v8, %v678_v11 }
 0x48d   :  { %682 = vst.msk [vmem:[#allocation10 + $0x8] sm:$0xff] %vm92_vm0, %v679_v12 }
 0x48e   :  { %695 = dma.vmem_to_hbm [thread:$0]  %s688_s25, 256, %s690_s28, [#allocation6], %s906_s30, %s906_s30, %s907_s1  }
 0x48f   :  { %900 = dma.done.wait [#allocation6], 256  }
 0x490   :  { %901 = vsyncadd [#allocation6], 4294967040 }
 0x491   :  { %700 = vsyncpa [#allocation5], 1 }
 0x492   :  { %701 = vsyncpa [#allocation8], 1 }
 0x493   :  { %702 = vsyncpa [#allocation6], 1 }

</bundles_post_ra>
